<compile_context>
chip_gen: v7x
topology: tpu7x:2x2x1
jax: 0.10.0
libtpu: 0.0.40
codegen_flags: <defaults>
</compile_context>

<pallas_src>
import math

import jax
import jax.numpy as jnp
from jax.experimental import pallas as pl
from jax.experimental.pallas import tpu as pltpu

HIDDEN = 100        # hidden_dim
INPUT_DIM = 28      # input_dim
NUM_LAYERS = 3      # layer_dim
OUTPUT_DIM = 10     # output_dim
HP = 128            # hidden/feature dim padded to lane width
OUT_PAD = 128       # FC output padded to lane width (lane-dense stores)
PARAM_DTYPE = jnp.bfloat16   # MXU operand dtype; accumulation stays f32
SEQ_DTYPE = jnp.bfloat16     # inter-layer sequence storage dtype

# torch gate order is (i, f, g, o); kernel uses (i, f, o, g) so the three
# sigmoid gates form one contiguous slab and tanh gets the last slab.
GATE_PERM = (0, 1, 3, 2)


def lstm_fc_kernel(x_ref, wih_ref, whh_ref, b_ref, fcw_ref, fcb_ref,
                   out_ref, seq_ref, gx_ref):
    """One grid step == one LSTM layer.

    x_ref:   (T*B, HP)     bf16 time-major, zero-padded input (resident)
    wih_ref: (1, HP, 4*HP) bf16 this layer's input->gate weights (transposed)
    whh_ref: (1, HP, 4*HP) bf16 this layer's hidden->gate weights (transposed)
    b_ref:   (1, 1, 4*HP)  f32  b_ih + b_hh
    fcw_ref: (HP, OUT_PAD) bf16 final Linear weight (transposed, padded)
    fcb_ref: (1, OUT_PAD)  f32
    out_ref: (B, OUT_PAD)  f32  written on the last layer only
    seq_ref: (T*B, HP)     bf16 VMEM scratch carrying this layer's output
                                sequence (time-major) to the next grid step
    gx_ref:  (T*B, 4*HP)   f32  VMEM scratch for the hoisted gate pre-acts
    """
    layer = pl.program_id(0)
    B = out_ref.shape[0]
    T = seq_ref.shape[0] // B

    @pl.when(layer == 0)
    def _():
        seq_ref[...] = x_ref[...]

    wih = wih_ref[0]                     # (HP, 4*HP) bf16
    whh = whh_ref[0]                     # (HP, 4*HP) bf16
    b = b_ref[0]                         # (1, 4*HP)  f32

    # Hoisted input projection: one (T*B, HP) x (HP, 4*HP) matmul covers the
    # x-contribution + bias of every timestep of this layer.  It is written
    # straight to VMEM scratch so its 32 KiB never stays live (in vregs)
    # across the unrolled recurrence.
    gx_ref[...] = jnp.dot(seq_ref[...], wih,
                          preferred_element_type=jnp.float32) + b

    h = jnp.zeros((B, HP), jnp.float32)
    c = jnp.zeros((B, HP), jnp.float32)
    h_seq = []

    # TODO(synk): keep whh resident in the MXU across the recurrence via
    # pltpu.matmul_push_rhs / matmul_acc_lhs / matmul_pop (per-chip MXU tile
    # mapping differs on v5e vs v6e/v7x), and/or wavefront-schedule layers
    # across TensorCores; kept as jnp.dot so the kernel lowers portably.
    for t in range(T):                   # T is small & static: full unroll
        gates = gx_ref[pl.ds(t * B, B), :]       # contiguous time-major rows
        if t > 0:                        # h == 0 at t == 0: skip the matmul
            gates = gates + jnp.dot(h.astype(PARAM_DTYPE), whh,
                                    preferred_element_type=jnp.float32)
        sig = jax.nn.sigmoid(gates[:, :3 * HP])  # (i | f | o) in one slab
        i_g = sig[:, 0 * HP:1 * HP]
        f_g = sig[:, 1 * HP:2 * HP]
        o_g = sig[:, 2 * HP:3 * HP]
        g_g = jnp.tanh(gates[:, 3 * HP:])
        c = f_g * c + i_g * g_g
        h = o_g * jnp.tanh(c)
        h_seq.append(h)

    # One bulk, unmasked (T*B, HP) writeback for the next layer; the last
    # layer only needs h at t = T-1, so skip it there.
    @pl.when(layer < NUM_LAYERS - 1)
    def _():
        seq_ref[...] = jnp.concatenate(h_seq, axis=0).astype(SEQ_DTYPE)

    @pl.when(layer == NUM_LAYERS - 1)
    def _():
        logits = (jnp.dot(h.astype(PARAM_DTYPE), fcw_ref[...],
                          preferred_element_type=jnp.float32)
                  + fcb_ref[...])
        out_ref[...] = logits


def pack_params(layer_params, fc_w, fc_b):
    """Pad / transpose / gate-reorder torch-convention LSTM params.

    Invariant: all padded rows/cols/bias lanes are exactly zero (and zero is
    exact in bf16), so padded hidden lanes remain zero in the recurrence.
    """
    perm = jnp.array(GATE_PERM)
    wih_list, whh_list, b_list = [], [], []
    for (w_ih, w_hh, b_ih, b_hh) in layer_params:
        in_dim = w_ih.shape[1]
        # w_ih: (4H, in) -> (4, H, in) -> reorder gates -> (4, in, H) -> pad.
        w4 = jnp.transpose(w_ih.reshape(4, HIDDEN, in_dim)[perm], (0, 2, 1))
        w4p = jnp.zeros((4, HP, HP), jnp.float32).at[:, :in_dim, :HIDDEN].set(w4)
        wih_t = jnp.transpose(w4p, (1, 0, 2)).reshape(HP, 4 * HP)
        # w_hh: (4H, H) -> (HP, 4*HP)
        wh4 = jnp.transpose(w_hh.reshape(4, HIDDEN, HIDDEN)[perm], (0, 2, 1))
        wh4p = jnp.zeros((4, HP, HP), jnp.float32).at[:, :HIDDEN, :HIDDEN].set(wh4)
        whh_t = jnp.transpose(wh4p, (1, 0, 2)).reshape(HP, 4 * HP)
        # bias: b_ih + b_hh, reordered & padded per gate.
        bias = (b_ih + b_hh).reshape(4, HIDDEN)[perm]
        bias_p = jnp.zeros((4, HP), jnp.float32).at[:, :HIDDEN].set(bias)
        wih_list.append(wih_t)
        whh_list.append(whh_t)
        b_list.append(bias_p.reshape(1, 4 * HP))
    wih = jnp.stack(wih_list).astype(PARAM_DTYPE)     # (L, HP, 4*HP) bf16
    whh = jnp.stack(whh_list).astype(PARAM_DTYPE)     # (L, HP, 4*HP) bf16
    b = jnp.stack(b_list)                             # (L, 1, 4*HP)  f32
    fcw = (jnp.zeros((HP, OUT_PAD), jnp.float32)
           .at[:HIDDEN, :OUTPUT_DIM].set(fc_w.T)).astype(PARAM_DTYPE)
    fcb = jnp.zeros((1, OUT_PAD), jnp.float32).at[0, :OUTPUT_DIM].set(fc_b)
    return wih, whh, b, fcw, fcb


def lstm_forward(x, packed):
    B, T, F = x.shape
    # Time-major (T, B, HP) lane-padded input, flattened to (T*B, HP) and
    # stored bf16 (it is consumed as a bf16 MXU operand anyway).
    x_tm = jnp.zeros((T, B, HP), jnp.float32).at[:, :, :F].set(
        jnp.transpose(x, (1, 0, 2)))
    x_tm = x_tm.reshape(T * B, HP).astype(SEQ_DTYPE)
    wih, whh, b, fcw, fcb = packed
    out_pad = pl.pallas_call(
        lstm_fc_kernel,
        out_shape=jax.ShapeDtypeStruct((B, OUT_PAD), jnp.float32),
        grid=(NUM_LAYERS,),
        in_specs=[
            pl.BlockSpec((T * B, HP), lambda l: (0, 0)),          # x (resident)
            pl.BlockSpec((1, HP, 4 * HP), lambda l: (l, 0, 0)),   # W_ih[l]
            pl.BlockSpec((1, HP, 4 * HP), lambda l: (l, 0, 0)),   # W_hh[l]
            pl.BlockSpec((1, 1, 4 * HP), lambda l: (l, 0, 0)),    # bias[l]
            pl.BlockSpec((HP, OUT_PAD), lambda l: (0, 0)),        # fc weight
            pl.BlockSpec((1, OUT_PAD), lambda l: (0, 0)),         # fc bias
        ],
        out_specs=pl.BlockSpec((B, OUT_PAD), lambda l: (0, 0)),
        scratch_shapes=[
            pltpu.VMEM((T * B, HP), SEQ_DTYPE),          # inter-layer sequence
            pltpu.VMEM((T * B, 4 * HP), jnp.float32),    # hoisted gate preacts
        ],
        compiler_params=pltpu.CompilerParams(
            dimension_semantics=("arbitrary",)),
    )(x_tm, wih, whh, b, fcw, fcb)
    return out_pad[:, :OUTPUT_DIM]


lstm_forward = jax.jit(lstm_forward)


def lstm_reference(x, layer_params, fc_w, fc_b):
    """Pure-JAX f32 reference matching torch.nn.LSTM semantics."""
    B, T, _ = x.shape
    inp = x
    for (w_ih, w_hh, b_ih, b_hh) in layer_params:
        h = jnp.zeros((B, HIDDEN), jnp.float32)
        c = jnp.zeros((B, HIDDEN), jnp.float32)
        outs = []
        for t in range(T):
            g = inp[:, t, :] @ w_ih.T + h @ w_hh.T + b_ih + b_hh
            i_g = jax.nn.sigmoid(g[:, 0 * HIDDEN:1 * HIDDEN])
            f_g = jax.nn.sigmoid(g[:, 1 * HIDDEN:2 * HIDDEN])
            g_g = jnp.tanh(g[:, 2 * HIDDEN:3 * HIDDEN])
            o_g = jax.nn.sigmoid(g[:, 3 * HIDDEN:4 * HIDDEN])
            c = f_g * c + i_g * g_g
            h = o_g * jnp.tanh(c)
            outs.append(h)
        inp = jnp.stack(outs, axis=1)
    return inp[:, -1, :] @ fc_w.T + fc_b


def init_params(key):
    """Deterministic init matching torch.nn.LSTM / Linear default U(-k, k)."""
    bound = 1.0 / math.sqrt(HIDDEN)
    layer_params = []
    for layer in range(NUM_LAYERS):
        in_dim = INPUT_DIM if layer == 0 else HIDDEN
        key, k1, k2, k3, k4 = jax.random.split(key, 5)
        w_ih = jax.random.uniform(k1, (4 * HIDDEN, in_dim), jnp.float32, -bound, bound)
        w_hh = jax.random.uniform(k2, (4 * HIDDEN, HIDDEN), jnp.float32, -bound, bound)
        b_ih = jax.random.uniform(k3, (4 * HIDDEN,), jnp.float32, -bound, bound)
        b_hh = jax.random.uniform(k4, (4 * HIDDEN,), jnp.float32, -bound, bound)
        layer_params.append((w_ih, w_hh, b_ih, b_hh))
    key, k1, k2 = jax.random.split(key, 3)
    fc_w = jax.random.uniform(k1, (OUTPUT_DIM, HIDDEN), jnp.float32, -bound, bound)
    fc_b = jax.random.uniform(k2, (OUTPUT_DIM,), jnp.float32, -bound, bound)
    return layer_params, fc_w, fc_b


if __name__ == "__main__":
    key = jax.random.PRNGKey(0)
    key, pkey, xkey = jax.random.split(key, 3)

    layer_params, fc_w, fc_b = init_params(pkey)
    packed = pack_params(layer_params, fc_w, fc_b)

    B, T = 2, 8
    x = jax.random.normal(xkey, (B, T, INPUT_DIM), jnp.float32)

    out = jax.block_until_ready(lstm_forward(x, packed))
    ref = lstm_reference(x, layer_params, fc_w, fc_b)

    assert out.shape == (B, OUTPUT_DIM)
    # bf16 MXU operands / inter-layer activations (f32 accumulation, f32 cell
    # state) vs. the pure-f32 reference introduce ~1e-3-scale deviations at
    # these shapes.  Note: bf16 h as the recurrent-matmul LHS accumulates
    # rounding with T; fine at T=8, revisit for much longer sequences.
    assert jnp.allclose(out, ref, atol=1e-2, rtol=1e-2), (
        f"max abs diff {jnp.max(jnp.abs(out - ref))}")

    print("KERNEL_OK")
</pallas_src>

<mosaic_0001>
module attributes {stable_mosaic.version = 11 : i64} {
  func.func @lstm_fc_kernel(%arg0: i32, %arg1: memref<16x128xbf16, #tpu.memory_space<vmem>>, %arg2: memref<1x128x512xbf16, #tpu.memory_space<vmem>>, %arg3: memref<1x128x512xbf16, #tpu.memory_space<vmem>>, %arg4: memref<1x1x512xf32, #tpu.memory_space<vmem>>, %arg5: memref<128x128xbf16, #tpu.memory_space<vmem>>, %arg6: memref<1x128xf32, #tpu.memory_space<vmem>>, %arg7: memref<2x128xf32, #tpu.memory_space<vmem>>, %arg8: memref<16x128xbf16, #tpu.memory_space<vmem>>, %arg9: memref<16x512xf32, #tpu.memory_space<vmem>>) attributes {dimension_semantics = [#tpu.dimension_semantics<arbitrary>], iteration_bounds = array<i64: 3>, scalar_prefetch = 0 : i64, scratch_operands = 2 : i64, tpu.core_type = #tpu.core_type<tc>, window_params = [{pipeline_mode = #tpu.pipeline_mode<synchronous>, transform_indices = @transform_0, window_bounds = array<i64: 16, 128>}, {transform_indices = @transform_1, window_bounds = array<i64: 1, 128, 512>}, {transform_indices = @transform_2, window_bounds = array<i64: 1, 128, 512>}, {transform_indices = @transform_3, window_bounds = array<i64: 1, 1, 512>}, {pipeline_mode = #tpu.pipeline_mode<synchronous>, transform_indices = @transform_4, window_bounds = array<i64: 128, 128>}, {pipeline_mode = #tpu.pipeline_mode<synchronous>, transform_indices = @transform_5, window_bounds = array<i64: 1, 128>}, {pipeline_mode = #tpu.pipeline_mode<synchronous>, transform_indices = @transform_6, window_bounds = array<i64: 2, 128>}]} {
    %c0_i32 = arith.constant 0 : i32
    %0 = arith.cmpi eq, %arg0, %c0_i32 : i32
    %1 = arith.extui %0 : i1 to i32
    %c0_i32_0 = arith.constant 0 : i32
    %2 = arith.cmpi ne, %1, %c0_i32_0 : i32
    scf.if %2 {
      %c0_41 = arith.constant 0 : index
      %c0_42 = arith.constant 0 : index
      %178 = vector.load %arg1[%c0_41, %c0_42] : memref<16x128xbf16, #tpu.memory_space<vmem>>, vector<16x128xbf16>
      %c0_43 = arith.constant 0 : index
      %c0_44 = arith.constant 0 : index
      %179 = vector.load %arg8[%c0_43, %c0_44] : memref<16x128xbf16, #tpu.memory_space<vmem>>, vector<16x128xbf16>
      tpu.vector_store %arg8[%c0_43, %c0_44], %178 {strides = array<i32>} : memref<16x128xbf16, #tpu.memory_space<vmem>>, vector<16x128xbf16>,
    } else {
    }
    %c0 = arith.constant 0 : index
    %c0_1 = arith.constant 0 : index
    %c0_2 = arith.constant 0 : index
    %3 = vector.load %arg2[%c0, %c0_1, %c0_2] : memref<1x128x512xbf16, #tpu.memory_space<vmem>>, vector<1x128x512xbf16>
    %4 = vector.shape_cast %3 : vector<1x128x512xbf16> to vector<128x512xbf16>
    %c0_3 = arith.constant 0 : index
    %c0_4 = arith.constant 0 : index
    %c0_5 = arith.constant 0 : index
    %5 = vector.load %arg3[%c0_3, %c0_4, %c0_5] : memref<1x128x512xbf16, #tpu.memory_space<vmem>>, vector<1x128x512xbf16>
    %6 = vector.shape_cast %5 : vector<1x128x512xbf16> to vector<128x512xbf16>
    %c0_6 = arith.constant 0 : index
    %c0_7 = arith.constant 0 : index
    %c0_8 = arith.constant 0 : index
    %7 = vector.load %arg4[%c0_6, %c0_7, %c0_8] : memref<1x1x512xf32, #tpu.memory_space<vmem>>, vector<1x1x512xf32>
    %8 = vector.shape_cast %7 : vector<1x1x512xf32> to vector<1x512xf32>
    %c0_9 = arith.constant 0 : index
    %c0_10 = arith.constant 0 : index
    %9 = vector.load %arg8[%c0_9, %c0_10] : memref<16x128xbf16, #tpu.memory_space<vmem>>, vector<16x128xbf16>
    %cst = arith.constant dense<0.000000e+00> : vector<16x512xf32>
    %10 = tpu.matmul %9, %4, %cst {dimension_numbers = #tpu.dot_dimension_numbers<[1], [0], [0], [1], [0, 0, 1, 1], [], []>} : vector<16x128xbf16>, vector<128x512xbf16>, vector<16x512xf32> -> vector<16x512xf32>
    %11 = vector.broadcast %8 : vector<1x512xf32> to vector<16x512xf32>
    %12 = arith.addf %10, %11 : vector<16x512xf32>
    %c0_11 = arith.constant 0 : index
    %c0_12 = arith.constant 0 : index
    %13 = vector.load %arg9[%c0_11, %c0_12] : memref<16x512xf32, #tpu.memory_space<vmem>>, vector<16x512xf32>
    tpu.vector_store %arg9[%c0_11, %c0_12], %12 {strides = array<i32>} : memref<16x512xf32, #tpu.memory_space<vmem>>, vector<16x512xf32>,
    %cst_13 = arith.constant 0.000000e+00 : f32
    %14 = vector.broadcast %cst_13 : f32 to vector<2x128xf32>
    %c0_14 = arith.constant 0 : index
    %c0_15 = arith.constant 0 : index
    %15 = vector.load %arg9[%c0_14, %c0_15] : memref<16x512xf32, #tpu.memory_space<vmem>>, vector<2x512xf32>
    %16 = vector.extract_strided_slice %15 {offsets = [0, 0], sizes = [2, 384], strides = [1, 1]} : vector<2x512xf32> to vector<2x384xf32>
    %17 = arith.negf %16 : vector<2x384xf32>
    %18 = math.exp %17 : vector<2x384xf32>
    %cst_16 = arith.constant 1.000000e+00 : f32
    %19 = vector.broadcast %cst_16 : f32 to vector<2x384xf32>
    %20 = arith.addf %19, %18 : vector<2x384xf32>
    %21 = arith.divf %19, %20 : vector<2x384xf32>
    %22 = vector.extract_strided_slice %21 {offsets = [0, 0], sizes = [2, 128], strides = [1, 1]} : vector<2x384xf32> to vector<2x128xf32>
    %23 = vector.extract_strided_slice %21 {offsets = [0, 128], sizes = [2, 128], strides = [1, 1]} : vector<2x384xf32> to vector<2x128xf32>
    %24 = vector.extract_strided_slice %21 {offsets = [0, 256], sizes = [2, 128], strides = [1, 1]} : vector<2x384xf32> to vector<2x128xf32>
    %25 = vector.extract_strided_slice %15 {offsets = [0, 384], sizes = [2, 128], strides = [1, 1]} : vector<2x512xf32> to vector<2x128xf32>
    %26 = math.tanh %25 : vector<2x128xf32>
    %27 = arith.mulf %23, %14 : vector<2x128xf32>
    %28 = arith.mulf %22, %26 : vector<2x128xf32>
    %29 = arith.addf %27, %28 : vector<2x128xf32>
    %30 = math.tanh %29 : vector<2x128xf32>
    %31 = arith.mulf %24, %30 : vector<2x128xf32>
    %c2 = arith.constant 2 : index
    %c0_17 = arith.constant 0 : index
    %32 = vector.load %arg9[%c2, %c0_17] : memref<16x512xf32, #tpu.memory_space<vmem>>, vector<2x512xf32>
    %33 = arith.truncf %31 : vector<2x128xf32> to vector<2x128xbf16>
    %cst_18 = arith.constant dense<0.000000e+00> : vector<2x512xf32>
    %34 = tpu.matmul %33, %6, %cst_18 {dimension_numbers = #tpu.dot_dimension_numbers<[1], [0], [0], [1], [0, 0, 1, 1], [], []>} : vector<2x128xbf16>, vector<128x512xbf16>, vector<2x512xf32> -> vector<2x512xf32>
    %35 = arith.addf %32, %34 : vector<2x512xf32>
    %36 = vector.extract_strided_slice %35 {offsets = [0, 0], sizes = [2, 384], strides = [1, 1]} : vector<2x512xf32> to vector<2x384xf32>
    %37 = arith.negf %36 : vector<2x384xf32>
    %38 = math.exp %37 : vector<2x384xf32>
    %cst_19 = arith.constant 1.000000e+00 : f32
    %39 = vector.broadcast %cst_19 : f32 to vector<2x384xf32>
    %40 = arith.addf %39, %38 : vector<2x384xf32>
    %41 = arith.divf %39, %40 : vector<2x384xf32>
    %42 = vector.extract_strided_slice %41 {offsets = [0, 0], sizes = [2, 128], strides = [1, 1]} : vector<2x384xf32> to vector<2x128xf32>
    %43 = vector.extract_strided_slice %41 {offsets = [0, 128], sizes = [2, 128], strides = [1, 1]} : vector<2x384xf32> to vector<2x128xf32>
    %44 = vector.extract_strided_slice %41 {offsets = [0, 256], sizes = [2, 128], strides = [1, 1]} : vector<2x384xf32> to vector<2x128xf32>
    %45 = vector.extract_strided_slice %35 {offsets = [0, 384], sizes = [2, 128], strides = [1, 1]} : vector<2x512xf32> to vector<2x128xf32>
    %46 = math.tanh %45 : vector<2x128xf32>
    %47 = arith.mulf %43, %29 : vector<2x128xf32>
    %48 = arith.mulf %42, %46 : vector<2x128xf32>
    %49 = arith.addf %47, %48 : vector<2x128xf32>
    %50 = math.tanh %49 : vector<2x128xf32>
    %51 = arith.mulf %44, %50 : vector<2x128xf32>
    %c4 = arith.constant 4 : index
    %c0_20 = arith.constant 0 : index
    %52 = vector.load %arg9[%c4, %c0_20] : memref<16x512xf32, #tpu.memory_space<vmem>>, vector<2x512xf32>
    %53 = arith.truncf %51 : vector<2x128xf32> to vector<2x128xbf16>
    %cst_21 = arith.constant dense<0.000000e+00> : vector<2x512xf32>
    %54 = tpu.matmul %53, %6, %cst_21 {dimension_numbers = #tpu.dot_dimension_numbers<[1], [0], [0], [1], [0, 0, 1, 1], [], []>} : vector<2x128xbf16>, vector<128x512xbf16>, vector<2x512xf32> -> vector<2x512xf32>
    %55 = arith.addf %52, %54 : vector<2x512xf32>
    %56 = vector.extract_strided_slice %55 {offsets = [0, 0], sizes = [2, 384], strides = [1, 1]} : vector<2x512xf32> to vector<2x384xf32>
    %57 = arith.negf %56 : vector<2x384xf32>
    %58 = math.exp %57 : vector<2x384xf32>
    %cst_22 = arith.constant 1.000000e+00 : f32
    %59 = vector.broadcast %cst_22 : f32 to vector<2x384xf32>
    %60 = arith.addf %59, %58 : vector<2x384xf32>
    %61 = arith.divf %59, %60 : vector<2x384xf32>
    %62 = vector.extract_strided_slice %61 {offsets = [0, 0], sizes = [2, 128], strides = [1, 1]} : vector<2x384xf32> to vector<2x128xf32>
    %63 = vector.extract_strided_slice %61 {offsets = [0, 128], sizes = [2, 128], strides = [1, 1]} : vector<2x384xf32> to vector<2x128xf32>
    %64 = vector.extract_strided_slice %61 {offsets = [0, 256], sizes = [2, 128], strides = [1, 1]} : vector<2x384xf32> to vector<2x128xf32>
    %65 = vector.extract_strided_slice %55 {offsets = [0, 384], sizes = [2, 128], strides = [1, 1]} : vector<2x512xf32> to vector<2x128xf32>
    %66 = math.tanh %65 : vector<2x128xf32>
    %67 = arith.mulf %63, %49 : vector<2x128xf32>
    %68 = arith.mulf %62, %66 : vector<2x128xf32>
    %69 = arith.addf %67, %68 : vector<2x128xf32>
    %70 = math.tanh %69 : vector<2x128xf32>
    %71 = arith.mulf %64, %70 : vector<2x128xf32>
    %c6 = arith.constant 6 : index
    %c0_23 = arith.constant 0 : index
    %72 = vector.load %arg9[%c6, %c0_23] : memref<16x512xf32, #tpu.memory_space<vmem>>, vector<2x512xf32>
    %73 = arith.truncf %71 : vector<2x128xf32> to vector<2x128xbf16>
    %cst_24 = arith.constant dense<0.000000e+00> : vector<2x512xf32>
    %74 = tpu.matmul %73, %6, %cst_24 {dimension_numbers = #tpu.dot_dimension_numbers<[1], [0], [0], [1], [0, 0, 1, 1], [], []>} : vector<2x128xbf16>, vector<128x512xbf16>, vector<2x512xf32> -> vector<2x512xf32>
    %75 = arith.addf %72, %74 : vector<2x512xf32>
    %76 = vector.extract_strided_slice %75 {offsets = [0, 0], sizes = [2, 384], strides = [1, 1]} : vector<2x512xf32> to vector<2x384xf32>
    %77 = arith.negf %76 : vector<2x384xf32>
    %78 = math.exp %77 : vector<2x384xf32>
    %cst_25 = arith.constant 1.000000e+00 : f32
    %79 = vector.broadcast %cst_25 : f32 to vector<2x384xf32>
    %80 = arith.addf %79, %78 : vector<2x384xf32>
    %81 = arith.divf %79, %80 : vector<2x384xf32>
    %82 = vector.extract_strided_slice %81 {offsets = [0, 0], sizes = [2, 128], strides = [1, 1]} : vector<2x384xf32> to vector<2x128xf32>
    %83 = vector.extract_strided_slice %81 {offsets = [0, 128], sizes = [2, 128], strides = [1, 1]} : vector<2x384xf32> to vector<2x128xf32>
    %84 = vector.extract_strided_slice %81 {offsets = [0, 256], sizes = [2, 128], strides = [1, 1]} : vector<2x384xf32> to vector<2x128xf32>
    %85 = vector.extract_strided_slice %75 {offsets = [0, 384], sizes = [2, 128], strides = [1, 1]} : vector<2x512xf32> to vector<2x128xf32>
    %86 = math.tanh %85 : vector<2x128xf32>
    %87 = arith.mulf %83, %69 : vector<2x128xf32>
    %88 = arith.mulf %82, %86 : vector<2x128xf32>
    %89 = arith.addf %87, %88 : vector<2x128xf32>
    %90 = math.tanh %89 : vector<2x128xf32>
    %91 = arith.mulf %84, %90 : vector<2x128xf32>
    %c8 = arith.constant 8 : index
    %c0_26 = arith.constant 0 : index
    %92 = vector.load %arg9[%c8, %c0_26] : memref<16x512xf32, #tpu.memory_space<vmem>>, vector<2x512xf32>
    %93 = arith.truncf %91 : vector<2x128xf32> to vector<2x128xbf16>
    %cst_27 = arith.constant dense<0.000000e+00> : vector<2x512xf32>
    %94 = tpu.matmul %93, %6, %cst_27 {dimension_numbers = #tpu.dot_dimension_numbers<[1], [0], [0], [1], [0, 0, 1, 1], [], []>} : vector<2x128xbf16>, vector<128x512xbf16>, vector<2x512xf32> -> vector<2x512xf32>
    %95 = arith.addf %92, %94 : vector<2x512xf32>
    %96 = vector.extract_strided_slice %95 {offsets = [0, 0], sizes = [2, 384], strides = [1, 1]} : vector<2x512xf32> to vector<2x384xf32>
    %97 = arith.negf %96 : vector<2x384xf32>
    %98 = math.exp %97 : vector<2x384xf32>
    %cst_28 = arith.constant 1.000000e+00 : f32
    %99 = vector.broadcast %cst_28 : f32 to vector<2x384xf32>
    %100 = arith.addf %99, %98 : vector<2x384xf32>
    %101 = arith.divf %99, %100 : vector<2x384xf32>
    %102 = vector.extract_strided_slice %101 {offsets = [0, 0], sizes = [2, 128], strides = [1, 1]} : vector<2x384xf32> to vector<2x128xf32>
    %103 = vector.extract_strided_slice %101 {offsets = [0, 128], sizes = [2, 128], strides = [1, 1]} : vector<2x384xf32> to vector<2x128xf32>
    %104 = vector.extract_strided_slice %101 {offsets = [0, 256], sizes = [2, 128], strides = [1, 1]} : vector<2x384xf32> to vector<2x128xf32>
    %105 = vector.extract_strided_slice %95 {offsets = [0, 384], sizes = [2, 128], strides = [1, 1]} : vector<2x512xf32> to vector<2x128xf32>
    %106 = math.tanh %105 : vector<2x128xf32>
    %107 = arith.mulf %103, %89 : vector<2x128xf32>
    %108 = arith.mulf %102, %106 : vector<2x128xf32>
    %109 = arith.addf %107, %108 : vector<2x128xf32>
    %110 = math.tanh %109 : vector<2x128xf32>
    %111 = arith.mulf %104, %110 : vector<2x128xf32>
    %c10 = arith.constant 10 : index
    %c0_29 = arith.constant 0 : index
    %112 = vector.load %arg9[%c10, %c0_29] : memref<16x512xf32, #tpu.memory_space<vmem>>, vector<2x512xf32>
    %113 = arith.truncf %111 : vector<2x128xf32> to vector<2x128xbf16>
    %cst_30 = arith.constant dense<0.000000e+00> : vector<2x512xf32>
    %114 = tpu.matmul %113, %6, %cst_30 {dimension_numbers = #tpu.dot_dimension_numbers<[1], [0], [0], [1], [0, 0, 1, 1], [], []>} : vector<2x128xbf16>, vector<128x512xbf16>, vector<2x512xf32> -> vector<2x512xf32>
    %115 = arith.addf %112, %114 : vector<2x512xf32>
    %116 = vector.extract_strided_slice %115 {offsets = [0, 0], sizes = [2, 384], strides = [1, 1]} : vector<2x512xf32> to vector<2x384xf32>
    %117 = arith.negf %116 : vector<2x384xf32>
    %118 = math.exp %117 : vector<2x384xf32>
    %cst_31 = arith.constant 1.000000e+00 : f32
    %119 = vector.broadcast %cst_31 : f32 to vector<2x384xf32>
    %120 = arith.addf %119, %118 : vector<2x384xf32>
    %121 = arith.divf %119, %120 : vector<2x384xf32>
    %122 = vector.extract_strided_slice %121 {offsets = [0, 0], sizes = [2, 128], strides = [1, 1]} : vector<2x384xf32> to vector<2x128xf32>
    %123 = vector.extract_strided_slice %121 {offsets = [0, 128], sizes = [2, 128], strides = [1, 1]} : vector<2x384xf32> to vector<2x128xf32>
    %124 = vector.extract_strided_slice %121 {offsets = [0, 256], sizes = [2, 128], strides = [1, 1]} : vector<2x384xf32> to vector<2x128xf32>
    %125 = vector.extract_strided_slice %115 {offsets = [0, 384], sizes = [2, 128], strides = [1, 1]} : vector<2x512xf32> to vector<2x128xf32>
    %126 = math.tanh %125 : vector<2x128xf32>
    %127 = arith.mulf %123, %109 : vector<2x128xf32>
    %128 = arith.mulf %122, %126 : vector<2x128xf32>
    %129 = arith.addf %127, %128 : vector<2x128xf32>
    %130 = math.tanh %129 : vector<2x128xf32>
    %131 = arith.mulf %124, %130 : vector<2x128xf32>
    %c12 = arith.constant 12 : index
    %c0_32 = arith.constant 0 : index
    %132 = vector.load %arg9[%c12, %c0_32] : memref<16x512xf32, #tpu.memory_space<vmem>>, vector<2x512xf32>
    %133 = arith.truncf %131 : vector<2x128xf32> to vector<2x128xbf16>
    %cst_33 = arith.constant dense<0.000000e+00> : vector<2x512xf32>
    %134 = tpu.matmul %133, %6, %cst_33 {dimension_numbers = #tpu.dot_dimension_numbers<[1], [0], [0], [1], [0, 0, 1, 1], [], []>} : vector<2x128xbf16>, vector<128x512xbf16>, vector<2x512xf32> -> vector<2x512xf32>
    %135 = arith.addf %132, %134 : vector<2x512xf32>
    %136 = vector.extract_strided_slice %135 {offsets = [0, 0], sizes = [2, 384], strides = [1, 1]} : vector<2x512xf32> to vector<2x384xf32>
    %137 = arith.negf %136 : vector<2x384xf32>
    %138 = math.exp %137 : vector<2x384xf32>
    %cst_34 = arith.constant 1.000000e+00 : f32
    %139 = vector.broadcast %cst_34 : f32 to vector<2x384xf32>
    %140 = arith.addf %139, %138 : vector<2x384xf32>
    %141 = arith.divf %139, %140 : vector<2x384xf32>
    %142 = vector.extract_strided_slice %141 {offsets = [0, 0], sizes = [2, 128], strides = [1, 1]} : vector<2x384xf32> to vector<2x128xf32>
    %143 = vector.extract_strided_slice %141 {offsets = [0, 128], sizes = [2, 128], strides = [1, 1]} : vector<2x384xf32> to vector<2x128xf32>
    %144 = vector.extract_strided_slice %141 {offsets = [0, 256], sizes = [2, 128], strides = [1, 1]} : vector<2x384xf32> to vector<2x128xf32>
    %145 = vector.extract_strided_slice %135 {offsets = [0, 384], sizes = [2, 128], strides = [1, 1]} : vector<2x512xf32> to vector<2x128xf32>
    %146 = math.tanh %145 : vector<2x128xf32>
    %147 = arith.mulf %143, %129 : vector<2x128xf32>
    %148 = arith.mulf %142, %146 : vector<2x128xf32>
    %149 = arith.addf %147, %148 : vector<2x128xf32>
    %150 = math.tanh %149 : vector<2x128xf32>
    %151 = arith.mulf %144, %150 : vector<2x128xf32>
    %c14 = arith.constant 14 : index
    %c0_35 = arith.constant 0 : index
    %152 = vector.load %arg9[%c14, %c0_35] : memref<16x512xf32, #tpu.memory_space<vmem>>, vector<2x512xf32>
    %153 = arith.truncf %151 : vector<2x128xf32> to vector<2x128xbf16>
    %cst_36 = arith.constant dense<0.000000e+00> : vector<2x512xf32>
    %154 = tpu.matmul %153, %6, %cst_36 {dimension_numbers = #tpu.dot_dimension_numbers<[1], [0], [0], [1], [0, 0, 1, 1], [], []>} : vector<2x128xbf16>, vector<128x512xbf16>, vector<2x512xf32> -> vector<2x512xf32>
    %155 = arith.addf %152, %154 : vector<2x512xf32>
    %156 = vector.extract_strided_slice %155 {offsets = [0, 0], sizes = [2, 384], strides = [1, 1]} : vector<2x512xf32> to vector<2x384xf32>
    %157 = arith.negf %156 : vector<2x384xf32>
    %158 = math.exp %157 : vector<2x384xf32>
    %cst_37 = arith.constant 1.000000e+00 : f32
    %159 = vector.broadcast %cst_37 : f32 to vector<2x384xf32>
    %160 = arith.addf %159, %158 : vector<2x384xf32>
    %161 = arith.divf %159, %160 : vector<2x384xf32>
    %162 = vector.extract_strided_slice %161 {offsets = [0, 0], sizes = [2, 128], strides = [1, 1]} : vector<2x384xf32> to vector<2x128xf32>
    %163 = vector.extract_strided_slice %161 {offsets = [0, 128], sizes = [2, 128], strides = [1, 1]} : vector<2x384xf32> to vector<2x128xf32>
    %164 = vector.extract_strided_slice %161 {offsets = [0, 256], sizes = [2, 128], strides = [1, 1]} : vector<2x384xf32> to vector<2x128xf32>
    %165 = vector.extract_strided_slice %155 {offsets = [0, 384], sizes = [2, 128], strides = [1, 1]} : vector<2x512xf32> to vector<2x128xf32>
    %166 = math.tanh %165 : vector<2x128xf32>
    %167 = arith.mulf %163, %149 : vector<2x128xf32>
    %168 = arith.mulf %162, %166 : vector<2x128xf32>
    %169 = arith.addf %167, %168 : vector<2x128xf32>
    %170 = math.tanh %169 : vector<2x128xf32>
    %171 = arith.mulf %164, %170 : vector<2x128xf32>
    %c2_i32 = arith.constant 2 : i32
    %172 = arith.cmpi slt, %arg0, %c2_i32 : i32
    %173 = arith.extui %172 : i1 to i32
    %c0_i32_38 = arith.constant 0 : i32
    %174 = arith.cmpi ne, %173, %c0_i32_38 : i32
    scf.if %174 {
      %178 = tpu.concatenate %31, %51, %71, %91, %111, %131, %151, %171 in 0 : vector<2x128xf32>, vector<2x128xf32>, vector<2x128xf32>, vector<2x128xf32>, vector<2x128xf32>, vector<2x128xf32>, vector<2x128xf32>, vector<2x128xf32> -> vector<16x128xf32>
      %179 = arith.truncf %178 : vector<16x128xf32> to vector<16x128xbf16>
      %c0_41 = arith.constant 0 : index
      %c0_42 = arith.constant 0 : index
      %180 = vector.load %arg8[%c0_41, %c0_42] : memref<16x128xbf16, #tpu.memory_space<vmem>>, vector<16x128xbf16>
      tpu.vector_store %arg8[%c0_41, %c0_42], %179 {strides = array<i32>} : memref<16x128xbf16, #tpu.memory_space<vmem>>, vector<16x128xbf16>,
    } else {
    }
    %c2_i32_39 = arith.constant 2 : i32
    %175 = arith.cmpi eq, %arg0, %c2_i32_39 : i32
    %176 = arith.extui %175 : i1 to i32
    %c0_i32_40 = arith.constant 0 : i32
    %177 = arith.cmpi ne, %176, %c0_i32_40 : i32
    scf.if %177 {
      %178 = arith.truncf %171 : vector<2x128xf32> to vector<2x128xbf16>
      %c0_41 = arith.constant 0 : index
      %c0_42 = arith.constant 0 : index
      %179 = vector.load %arg5[%c0_41, %c0_42] : memref<128x128xbf16, #tpu.memory_space<vmem>>, vector<128x128xbf16>
      %cst_43 = arith.constant dense<0.000000e+00> : vector<2x128xf32>
      %180 = tpu.matmul %178, %179, %cst_43 {dimension_numbers = #tpu.dot_dimension_numbers<[1], [0], [0], [1], [0, 0, 1, 1], [], []>} : vector<2x128xbf16>, vector<128x128xbf16>, vector<2x128xf32> -> vector<2x128xf32>
      %c0_44 = arith.constant 0 : index
      %c0_45 = arith.constant 0 : index
      %181 = vector.load %arg6[%c0_44, %c0_45] : memref<1x128xf32, #tpu.memory_space<vmem>>, vector<1x128xf32>
      %182 = vector.broadcast %181 : vector<1x128xf32> to vector<2x128xf32>
      %183 = arith.addf %180, %182 : vector<2x128xf32>
      %c0_46 = arith.constant 0 : index
      %c0_47 = arith.constant 0 : index
      %184 = vector.load %arg7[%c0_46, %c0_47] : memref<2x128xf32, #tpu.memory_space<vmem>>, vector<2x128xf32>
      tpu.vector_store %arg7[%c0_46, %c0_47], %183 {strides = array<i32>} : memref<2x128xf32, #tpu.memory_space<vmem>>, vector<2x128xf32>,
    } else {
    }
    return
  }
  func.func @transform_0(%arg0: i32) -> (i32, i32) {
    %c0_i32 = arith.constant 0 : i32
    %c0_i32_0 = arith.constant 0 : i32
    %c0_i32_1 = arith.constant 0 : i32
    return %c0_i32, %c0_i32_0 : i32, i32
  }
  func.func @transform_1(%arg0: i32) -> (i32, i32, i32) {
    %c0_i32 = arith.constant 0 : i32
    %c0_i32_0 = arith.constant 0 : i32
    %c0_i32_1 = arith.constant 0 : i32
    return %arg0, %c0_i32, %c0_i32_0 : i32, i32, i32
  }
  func.func @transform_2(%arg0: i32) -> (i32, i32, i32) {
    %c0_i32 = arith.constant 0 : i32
    %c0_i32_0 = arith.constant 0 : i32
    %c0_i32_1 = arith.constant 0 : i32
    return %arg0, %c0_i32, %c0_i32_0 : i32, i32, i32
  }
  func.func @transform_3(%arg0: i32) -> (i32, i32, i32) {
    %c0_i32 = arith.constant 0 : i32
    %c0_i32_0 = arith.constant 0 : i32
    %c0_i32_1 = arith.constant 0 : i32
    return %arg0, %c0_i32, %c0_i32_0 : i32, i32, i32
  }
  func.func @transform_4(%arg0: i32) -> (i32, i32) {
    %c0_i32 = arith.constant 0 : i32
    %c0_i32_0 = arith.constant 0 : i32
    %c0_i32_1 = arith.constant 0 : i32
    return %c0_i32, %c0_i32_0 : i32, i32
  }
  func.func @transform_5(%arg0: i32) -> (i32, i32) {
    %c0_i32 = arith.constant 0 : i32
    %c0_i32_0 = arith.constant 0 : i32
    %c0_i32_1 = arith.constant 0 : i32
    return %c0_i32, %c0_i32_0 : i32, i32
  }
  func.func @transform_6(%arg0: i32) -> (i32, i32) {
    %c0_i32 = arith.constant 0 : i32
    %c0_i32_0 = arith.constant 0 : i32
    %c0_i32_1 = arith.constant 0 : i32
    return %c0_i32, %c0_i32_0 : i32, i32
  }
}

</mosaic_0001>

<bundles_post_ra>
// kernel: lstm_forward.1
= control target key start
LH: loop header
LB: loop body
LE: loop exit
PB: predicated region body
PF: predicated region fallthrough
CT: control target
= control target key end

     0   :  { %s3377_s0 = inlined_call_operand.vmem [shape: bf16[16,128], index: 0, kind: input, shape index: {}]   ;;  %s3378_s1 = inlined_call_operand.hbm [shape: bf16[3,128,512], index: 1, kind: input, shape index: {}]   ;;  %s3379_s2 = inlined_call_operand.hbm [shape: bf16[3,128,512], index: 2, kind: input, shape index: {}]   ;;  %s3380_s3 = inlined_call_operand.hbm [shape: f32[3,1,512], index: 3, kind: input, shape index: {}]   ;;  %s3381_s4 = inlined_call_operand.vmem [shape: bf16[128,128], index: 4, kind: input, shape index: {}]   ;;  %s3382_s5 = inlined_call_operand.vmem [shape: f32[1,128], index: 5, kind: input, shape index: {}]   ;;  %s3383_s6 = inlined_call_operand.hbm [shape: f32[2,128], index: 6, kind: output, shape index: {}]  }
   0x1   :  { %3391 = sst [smem:[#allocation17_spill]] %s3378_s1 }
   0x2   :  { %3392 = sst [smem:[#allocation18_spill]] %s3379_s2 }
   0x3   :  { %11 = vsyncpa [#allocation5], 0 }
   0x4   :  { %13 = vsyncpa [#allocation5 + $0x1], 0 }
   0x5   :  { %14 = vsyncpa [#allocation8], 0 }
   0x6   :  { %16 = vsyncpa [#allocation8 + $0x1], 0 }
   0x7   :  { %17 = vsyncpa [#allocation6], 0  ;;  %s2705_s21 = smov 0   ;;  %s2707_s22 = smov 0  }
   0x8   :  { %s2709_s23 = smov 0   ;;  %s2711_s24 = smov 0  }
   0x9 LB: > { %3393 = sst [smem:[#allocation14_spill]] %s2655_s23  ;;  %s2724_s25 = sadd.s32 4294967295, %s2659_s24   ;;  %s2659_s24 = sphi %s2711_s24, %s3409_s24   ;;  %s2655_s23 = sphi %s2709_s23, %s3411_s23   ;;  %s2651_s22 = sphi %s2707_s22, %s3413_s22   ;;  %s2647_s21 = sphi %s2705_s21, %s3412_s21  }
   0xa   : > { %s2727_s26 = sadd.s32 1, %s2659_s24   ;;  %s51_s28 = sadd.s32 1, %s2655_s23 }
   0xb   : > { %3394 = sst [smem:[#allocation15_spill]] %s2727_s26  ;;  %s48_s27 = ssub.s32 %s2659_s24, %s2727_s26 }
   0xc   : > { %p49_p0 = scmp.eq.s32.totalorder %s48_s27, 0  ;;  %p58_p1 = scmp.ne.s32.totalorder %s2655_s23, %s2651_s22 }
   0xd   : > { %p59_p2 = scmp.eq.s32.totalorder %s2659_s24, 0  ;;  %p64_p3 = scmp.ne.s32.totalorder %s2651_s22, %s2647_s21 }
   0xe   : > { %s2737_s29 = scalar_select %p49_p0, %s2655_s23, %s51_s28  }
   0xf   : > { %p60_p4 = por %p59_p2, %p58_p1  ;;  %p65_p5 = scmp.eq.s32.totalorder %s2724_s25, 0 }
  0x10   : > { %3395 = sst [smem:[#allocation16_spill]] %s2737_s29  ;;  %p2197_p6 = scmp.lt.s32.totalorder %s2659_s24, 3 }
  0x11   : > { %p2741_p7 = por %p65_p5, %p64_p3  ;;  %s2746_s7 = sand.u32 1, %s2655_s23  }
  0x12   : > { %s2027_s8 = sshll.u32 %s2746_s7, 8  ;;  %s2145_s9 = sshll.u32 %s2659_s24, 12 }
  0x13   : > { %s3396_s30 = scalar_select %p2741_p7, 1, 0 }
  0x14   : > { %p2750_p8 = pnand %p2197_p6, %p60_p4  ;;  %s233_s11 = sand.u32 1, %s2659_s24  }
  0x15   : > { %s3398_s2 = sld [smem:[#allocation18_spill]]  ;;  %s237_s15 = scalar_lea.vmem [#allocation7], %s2027_s8 }
  0x16   : > { %s3397_s10 = scalar_select %p2750_p8, 1, 0 }
  0x17   : > { %s244_s16 = sshll.u32 %s237_s15, 4  ;;  %s2768_s17 = scalar_lea.sflag [#allocation8], %s233_s11  ;;  %s2765_s16 = int_to_ptr.vmem [resolvable:$true] %s244_s16 }
  0x18   : > { %p2774_p12 = pneg %p2750_p8 }
  0x1b   : > { %s2760_s14 = scalar_lea.hbm %s3398_s2, %s2145_s9  ;;  %s2506_s27 = scalar_lea.hbm %s3398_s2, 12288 }
  0x1c   : > { %s2501_s18 = scalar_lea.hbm %s2760_s14, 4096  ;;  %p2507_p1 = scmp.lt.u32.totalorder %s2760_s14, %s3398_s2 }
  0x1d   : > { %p2502_p11 = scmp.ne.s32.totalorder %s2760_s14, %s2501_s18  ;;  %p2508_p2 = scmp.lt.u32.totalorder %s2506_s27, %s2501_s18 }
  0x1e   : > { %p2510_p4 = scmp.lt.u32.totalorder %s2501_s18, %s2760_s14 }
  0x1f   : > { %p2504_p13 = pnand %p2774_p12, %p2502_p11  ;;  %p2509_p3 = por %p2508_p2, %p2507_p1 }
  0x21   : > { %p2505_p0 = pneg %p2504_p13  ;;  %p2511_p5 = por %p2510_p4, %p2509_p3 }
  0x23   : > { %p2512_p6 = pnand %p2511_p5, %p2505_p0 }
  0x25   : > { %2515 = shalt.err (!%p2512_p6)
}
  0x26   : > { %s2516_s11 = scalar_lea.vmem %s2765_s16, 4096  ;;  %s2661_s13 = smov [#allocation7]  }
  0x27   : > { %p2517_p11 = scmp.ne.s32.totalorder %s2765_s16, %s2516_s11  ;;  %s2521_s15 = sshll.u32 %s2661_s13, 4  ;;  %s2522_s15 = int_to_ptr.vmem [resolvable:$false] %s2521_s15 }
  0x28   : > { %s2523_s20 = scalar_lea.vmem %s2522_s15, 8192  ;;  %p2524_p10 = scmp.lt.s32.totalorder %s2765_s16, %s2522_s15 }
  0x29   : > { %p2519_p13 = pnand %p2517_p11, %p2774_p12  ;;  %p2525_p7 = scmp.lt.s32.totalorder %s2523_s20, %s2516_s11 }
  0x2b   : > { %p2520_p9 = pneg %p2519_p13  ;;  %p2526_p1 = por %p2525_p7, %p2524_p10 }
  0x2d   : > { %p2527_p2 = pnand %p2526_p1, %p2520_p9 }
  0x2f   : > { %2530 = shalt.err (!%p2527_p2)
}
  0x30   : > { %s3385_s18 = smov 256   ;;  %s3386_s21 = smov 16  }
  0x31   : > { %2193 = dma.hbm_to_vmem [thread:$0]  (!%p2750_p8), %s2760_s14, 4096, %s2765_s16, %s2768_s17, %s3385_s18, %s3385_s18, %s3386_s21  }
  0x32   : > { %p3400_p7 = scmp.lt.s32.totalorder %s2659_s24, 4  ;;  %p3401_p9 = scmp.ge.s32.totalorder %s2659_s24, 1 }
  0x33   : > { %s3403_s1 = sld [smem:[#allocation17_spill]]  ;;  %s216_s13 = scalar_lea.vmem [#allocation4], %s2027_s8 }
  0x34   : > { %p2805_p10 = pnand %p3401_p9, %p3400_p7  ;;  %s223_s15 = sshll.u32 %s216_s13, 4  ;;  %s2819_s15 = int_to_ptr.vmem [resolvable:$true] %s223_s15 }
  0x35   : > { %s2033_s14 = sshll.u32 %s2746_s7, 2  ;;  %s213_s16 = scalar_lea.sflag [#allocation5], %s2746_s7 }
  0x36   : > { %s3402_s27 = scalar_select %p2805_p10, 1, 0 }
  0x39   : > { %s2814_s11 = scalar_lea.hbm %s3403_s1, %s2145_s9  ;;  %s2536_s9 = scalar_lea.hbm %s3403_s1, 12288 }
  0x3a   : > { %s2531_s20 = scalar_lea.hbm %s2814_s11, 4096  ;;  %p2537_p5 = scmp.lt.u32.totalorder %s2814_s11, %s3403_s1 }
  0x3b   : > { %p2532_p0 = scmp.ne.s32.totalorder %s2814_s11, %s2531_s20  ;;  %p2538_p6 = scmp.lt.u32.totalorder %s2536_s9, %s2531_s20 }
  0x3c   : > { %p2540_p13 = scmp.lt.u32.totalorder %s2531_s20, %s2814_s11 }
  0x3d   : > { %p2534_p3 = pnand %p2532_p0, %p2774_p12  ;;  %p2539_p11 = por %p2538_p6, %p2537_p5 }
  0x3f   : > { %p2535_p4 = pneg %p2534_p3  ;;  %p2541_p1 = por %p2540_p13, %p2539_p11 }
  0x41   : > { %p2542_p2 = pnand %p2541_p1, %p2535_p4 }
  0x43   : > { %2545 = shalt.err (!%p2542_p2)
}
  0x44   : > { %s2546_s8 = scalar_lea.vmem %s2819_s15, 4096  ;;  %s2664_s18 = smov [#allocation4]  }
  0x45   : > { %p2547_p7 = scmp.ne.s32.totalorder %s2819_s15, %s2546_s8  ;;  %s2551_s13 = sshll.u32 %s2664_s18, 4  ;;  %s2552_s13 = int_to_ptr.vmem [resolvable:$false] %s2551_s13 }
  0x46   : > { %s2553_s21 = scalar_lea.vmem %s2552_s13, 8192  ;;  %p2554_p3 = scmp.lt.s32.totalorder %s2819_s15, %s2552_s13 }
  0x47   : > { %p2549_p9 = pnand %p2547_p7, %p2774_p12  ;;  %p2555_p10 = scmp.lt.s32.totalorder %s2553_s21, %s2546_s8 }
  0x49   : > { %p2550_p0 = pneg %p2549_p9  ;;  %p2556_p5 = por %p2555_p10, %p2554_p3 }
  0x4b   : > { %p2557_p6 = pnand %p2556_p5, %p2550_p0 }
  0x4d   : > { %2560 = shalt.err (!%p2557_p6)
}
  0x4e   : > { %s3404_s20 = smov 16   ;;  %s3405_s28 = smov 256  }
  0x4f   : > { %2190 = dma.hbm_to_vmem [thread:$0]  (!%p2750_p8), %s2814_s11, 4096, %s2819_s15, %s213_s16, %s3405_s28, %s3405_s28, %s3404_s20  }
  0x50   : > { %s2147_s9 = sshll.u32 %s2659_s24, 6  ;;  %s258_s12 = scalar_lea.vmem [#allocation9], %s2033_s14 }
  0x51   : > { %s266_s8 = sshll.u32 %s258_s12, 4  ;;  %s264_s21 = scalar_lea.hbm %s3380_s3, %s2147_s9  ;;  %s267_s8 = int_to_ptr.vmem [resolvable:$true] %s266_s8 }
  0x52   : > { %s2561_s1 = scalar_lea.hbm %s264_s21, 64  ;;  %s2566_s23 = scalar_lea.hbm %s3380_s3, 192 }
  0x53   : > { %p2562_p10 = scmp.ne.s32.totalorder %s264_s21, %s2561_s1  ;;  %p2567_p13 = scmp.lt.u32.totalorder %s264_s21, %s3380_s3 }
  0x54   : > { %p2568_p1 = scmp.lt.u32.totalorder %s2566_s23, %s2561_s1  ;;  %p2570_p7 = scmp.lt.u32.totalorder %s2561_s1, %s264_s21 }
  0x55   : > { %p2564_p4 = pnand %p2562_p10, %p2774_p12 }
  0x56   : > { %p2569_p2 = por %p2568_p1, %p2567_p13 }
  0x57   : > { %p2565_p11 = pneg %p2564_p4 }
  0x58   : > { %p2571_p9 = por %p2570_p7, %p2569_p2 }
  0x5a   : > { %p2572_p0 = pnand %p2571_p9, %p2565_p11 }
  0x5c   : > { %2575 = shalt.err (!%p2572_p0)
}
  0x5d   : > { %s2576_s24 = scalar_lea.vmem %s267_s8, 64  ;;  %s2665_s7 = smov [#allocation9]  }
  0x5e   : > { %p2577_p3 = scmp.ne.s32.totalorder %s267_s8, %s2576_s24  ;;  %s2581_s15 = sshll.u32 %s2665_s7, 4  ;;  %s2582_s15 = int_to_ptr.vmem [resolvable:$false] %s2581_s15 }
  0x5f   : > { %s2583_s2 = scalar_lea.vmem %s2582_s15, 128  ;;  %p2584_p10 = scmp.lt.s32.totalorder %s267_s8, %s2582_s15 }
  0x60   : > { %p2579_p5 = pnand %p2577_p3, %p2774_p12  ;;  %p2585_p4 = scmp.lt.s32.totalorder %s2583_s2, %s2576_s24 }
  0x62   : > { %p2580_p6 = pneg %p2579_p5  ;;  %p2586_p8 = por %p2585_p4, %p2584_p10 }
  0x64   : > { %p2587_p1 = pnand %p2586_p8, %p2580_p6 }
  0x66   : > { %2590 = shalt.err (!%p2587_p1)
}
  0x67   : > { %p3406_p13 = scmp.ne.s32.totalorder %s3397_s10, 0  ;;  %p3407_p11 = scmp.ne.s32.totalorder %s3402_s27, 0 }
  0x68   : > { %s277_s1 = sand.u32 (!%p3407_p11), 1, %s2651_s22   ;;  %p3408_p12 = scmp.ne.s32.totalorder (!%p3407_p11), %s3396_s30, 0 }
  0x69   : > { %2196 = dma.hbm_to_vmem [thread:$0]  (!%p3406_p13), %s264_s21, 64, %s267_s8, %s2768_s17  }
  0x6a   : > { %275 = sbr.rel (%p3407_p11) target bundleno = 2546 (0x9f2), region = 44  ;;  %s2037_s23 = sshll.u32 (!%p3407_p11), %s277_s1, 8 }
  0x6b   : > { %s278_s26 = scalar_lea.sflag (!%p3407_p11), [#allocation5], %s277_s1  ;;  %s2870_s29 = scalar_lea.vmem (!%p3407_p11), [#allocation4], %s2037_s23 }
  0x71   : > { %2634 = dma.done.wait (%p3408_p12), %s278_s26, 4096  }
  0x72   : > { %2636 = vsyncadd (%p3408_p12), %s278_s26, 4294963200  ;;  %s286_s10 = sand.u32 1, %s2724_s25   ;;  %s2877_s17 = scalar_lea.vmem [#allocation7], %s2037_s23 }
  0x73   : > { %s287_s19 = scalar_lea.sflag [#allocation8], %s286_s10 }
  0x74   : > { %2638 = dma.done.wait (%p3408_p12), %s287_s19, 4160  }
  0x75   : > { %2640 = vsyncadd (%p3408_p12), %s287_s19, 4294963136  ;;  %s2039_s27 = sshll.u32 %s277_s1, 2  ;;  %p2040_p8 = scmp.ne.s32.totalorder %s2724_s25, 0 }
  0x76   : > { %s2883_s14 = scalar_lea.vmem [#allocation9], %s2039_s27  ;;  %v2238_v0 = vld [vmem:[%s3377_s0] sm:$0xff] (!%p2040_p8)  }
  0x77   : > { %337 = sbr.rel (%p2040_p8) target bundleno = 126 (0x7e), region = 60  ;;  %346 = vst [vmem:[#allocation2] sm:$0xff] (!%p2040_p8), %v2238_v0 }
  0x7e PF: > { %v2239_v1 = vld [vmem:[%s2870_s29 + $0x4] ss:$16 sps:$4 sm:$0xff]   ;;  %v2241_v2 = vld [vmem:[%s2870_s29] ss:$16 sps:$4 sm:$0xff]   ;;  %v2666_v3 = vmov 0   ;;  %v412_v33 = vld [vmem:[#allocation2] sm:$0xff] }
  0x7f   : > { %626 = vmatprep.mubr.bf16.mxu0 %v2666_v3  ;;  %669 = vmatprep.mubr.bf16.mxu1 %v2666_v3  ;;  %v2242_v4 = vld [vmem:[%s2870_s29 + $0x24] ss:$16 sps:$4 sm:$0xff]   ;;  %v2244_v5 = vld [vmem:[%s2870_s29 + $0x20] ss:$16 sps:$4 sm:$0xff]   ;;  %v2250_v7 = vld [vmem:[%s2870_s29 + $0xc] ss:$16 sps:$4 sm:$0xff]  }
  0x80   : > { %594 = vmatprep.subr.bf16.mxu0 %v2239_v1  ;;  %v2245_v6 = vld [vmem:[%s2870_s29 + $0x44] ss:$16 sps:$4 sm:$0xff]   ;;  %v2253_v8 = vld [vmem:[%s2870_s29 + $0x8] ss:$16 sps:$4 sm:$0xff]   ;;  %v2247_v9 = vld [vmem:[%s2870_s29 + $0x40] ss:$16 sps:$4 sm:$0xff]   ;;  %637 = vmatprep.subr.bf16.mxu1 %v2250_v7 }
  0x81   : > { %595 = vmatpush1.bf16.msra.mxu0 %v2241_v2  ;;  %v2248_v10 = vld [vmem:[%s2870_s29 + $0x64] ss:$16 sps:$4 sm:$0xff]   ;;  %638 = vmatpush1.bf16.msra.mxu1 %v2253_v8  ;;  %v2256_v11 = vld [vmem:[%s2870_s29 + $0x2c] ss:$16 sps:$4 sm:$0xff]   ;;  %v2259_v12 = vld [vmem:[%s2870_s29 + $0x28] ss:$16 sps:$4 sm:$0xff]  }
  0x82   : > { %596 = vmatprep.subr.bf16.mxu0 %v2242_v4  ;;  %639 = vmatprep.subr.bf16.mxu1 %v2256_v11  ;;  %v2252_v13 = vld [vmem:[%s2870_s29 + $0x60] ss:$16 sps:$4 sm:$0xff]   ;;  %v2254_v14 = vld [vmem:[%s2870_s29 + $0x84] ss:$16 sps:$4 sm:$0xff]   ;;  %v2262_v15 = vld [vmem:[%s2870_s29 + $0x4c] ss:$16 sps:$4 sm:$0xff]   ;;  %v414_v4 = vlaneseq }
  0x83   : > { %v2265_v16 = vld [vmem:[%s2870_s29 + $0x48] ss:$16 sps:$4 sm:$0xff]   ;;  %v2268_v17 = vld [vmem:[%s2870_s29 + $0x6c] ss:$16 sps:$4 sm:$0xff]   ;;  %v2258_v18 = vld [vmem:[%s2870_s29 + $0x80] ss:$16 sps:$4 sm:$0xff]  }
  0x84   : > { %v2260_v19 = vld [vmem:[%s2870_s29 + $0xa4] ss:$16 sps:$4 sm:$0xff]   ;;  %v2271_v20 = vld [vmem:[%s2870_s29 + $0x68] ss:$16 sps:$4 sm:$0xff]   ;;  %v2274_v21 = vld [vmem:[%s2870_s29 + $0x8c] ss:$16 sps:$4 sm:$0xff]  }
  0x85   : > { %597 = vmatpush1.bf16.msra.mxu0 %v2244_v5  ;;  %640 = vmatpush1.bf16.msra.mxu1 %v2259_v12  ;;  %v2264_v22 = vld [vmem:[%s2870_s29 + $0xa0] ss:$16 sps:$4 sm:$0xff]   ;;  %v2266_v23 = vld [vmem:[%s2870_s29 + $0xc4] ss:$16 sps:$4 sm:$0xff]   ;;  %v2277_v24 = vld [vmem:[%s2870_s29 + $0x88] ss:$16 sps:$4 sm:$0xff]  }
  0x86   : > { %598 = vmatprep.subr.bf16.mxu0 %v2245_v6  ;;  %641 = vmatprep.subr.bf16.mxu1 %v2262_v15  ;;  %v2270_v25 = vld [vmem:[%s2870_s29 + $0xc0] ss:$16 sps:$4 sm:$0xff]   ;;  %v2278_v26 = vld [vmem:[%s2870_s29 + $0xac] ss:$16 sps:$4 sm:$0xff]   ;;  %v2272_v27 = vld [vmem:[%s2870_s29 + $0xe4] ss:$16 sps:$4 sm:$0xff]  }
  0x87   : > { %v2280_v28 = vld [vmem:[%s2870_s29 + $0xa8] ss:$16 sps:$4 sm:$0xff]   ;;  %v2281_v29 = vld [vmem:[%s2870_s29 + $0xcc] ss:$16 sps:$4 sm:$0xff]   ;;  %v2276_v30 = vld [vmem:[%s2870_s29 + $0xe0] ss:$16 sps:$4 sm:$0xff]  }
  0x88   : > { %v2283_v31 = vld [vmem:[%s2870_s29 + $0xc8] ss:$16 sps:$4 sm:$0xff]   ;;  %v2284_v32 = vld [vmem:[%s2870_s29 + $0xec] ss:$16 sps:$4 sm:$0xff]   ;;  %v2926_v35 = vld [vmem:[%s2877_s17 + $0x4] ss:$16 sps:$4 sm:$0xff]  }
  0x89   : > { %599 = vmatpush1.bf16.msra.mxu0 %v2247_v9  ;;  %642 = vmatpush1.bf16.msra.mxu1 %v2265_v16  ;;  %v2286_v34 = vld [vmem:[%s2870_s29 + $0xe8] ss:$16 sps:$4 sm:$0xff]   ;;  %v2929_v36 = vld [vmem:[%s2877_s17 + $0xc] ss:$16 sps:$4 sm:$0xff]   ;;  %v2932_v37 = vld [vmem:[%s2877_s17] ss:$16 sps:$4 sm:$0xff]  }
  0x8a   : > { %600 = vmatprep.subr.bf16.mxu0 %v2248_v10  ;;  %643 = vmatprep.subr.bf16.mxu1 %v2268_v17  ;;  %v2935_v38 = vld [vmem:[%s2877_s17 + $0x8] ss:$16 sps:$4 sm:$0xff]   ;;  %v2938_v39 = vld [vmem:[%s2877_s17 + $0x24] ss:$16 sps:$4 sm:$0xff]   ;;  %v2941_v40 = vld [vmem:[%s2877_s17 + $0x2c] ss:$16 sps:$4 sm:$0xff]  }
  0x8b   : > { %v2948_v41 = vld [vmem:[%s2877_s17 + $0x20] ss:$16 sps:$4 sm:$0xff]   ;;  %v2951_v42 = vld [vmem:[%s2877_s17 + $0x28] ss:$16 sps:$4 sm:$0xff]   ;;  %v2956_v43 = vld [vmem:[%s2877_s17 + $0x44] ss:$16 sps:$4 sm:$0xff]  }
  0x8c   : > { %v2959_v44 = vld [vmem:[%s2877_s17 + $0x4c] ss:$16 sps:$4 sm:$0xff]   ;;  %v2964_v45 = vld [vmem:[%s2877_s17 + $0x40] ss:$16 sps:$4 sm:$0xff]   ;;  %v2967_v46 = vld [vmem:[%s2877_s17 + $0x48] ss:$16 sps:$4 sm:$0xff]  }
  0x8d   : > { %601 = vmatpush1.bf16.msra.mxu0 %v2252_v13  ;;  %644 = vmatpush1.bf16.msra.mxu1 %v2271_v20  ;;  %v2972_v47 = vld [vmem:[%s2877_s17 + $0x64] ss:$16 sps:$4 sm:$0xff]   ;;  %v2975_v48 = vld [vmem:[%s2877_s17 + $0x6c] ss:$16 sps:$4 sm:$0xff]   ;;  %v2980_v49 = vld [vmem:[%s2877_s17 + $0x60] ss:$16 sps:$4 sm:$0xff]  }
  0x8e   : > { %602 = vmatprep.subr.bf16.mxu0 %v2254_v14  ;;  %645 = vmatprep.subr.bf16.mxu1 %v2274_v21  ;;  %v2983_v50 = vld [vmem:[%s2877_s17 + $0x68] ss:$16 sps:$4 sm:$0xff]   ;;  %v2988_v51 = vld [vmem:[%s2877_s17 + $0x84] ss:$16 sps:$4 sm:$0xff]   ;;  %v2991_v52 = vld [vmem:[%s2877_s17 + $0x8c] ss:$16 sps:$4 sm:$0xff]  }
  0x8f   : > { %v2996_v53 = vld [vmem:[%s2877_s17 + $0x80] ss:$16 sps:$4 sm:$0xff]   ;;  %v2999_v54 = vld [vmem:[%s2877_s17 + $0x88] ss:$16 sps:$4 sm:$0xff]   ;;  %v3004_v55 = vld [vmem:[%s2877_s17 + $0xa4] ss:$16 sps:$4 sm:$0xff]  }
  0x90   : > { %v3007_v56 = vld [vmem:[%s2877_s17 + $0xac] ss:$16 sps:$4 sm:$0xff]   ;;  %v3012_v57 = vld [vmem:[%s2877_s17 + $0xa0] ss:$16 sps:$4 sm:$0xff]   ;;  %v3015_v58 = vld [vmem:[%s2877_s17 + $0xa8] ss:$16 sps:$4 sm:$0xff]  }
  0x91   : > { %603 = vmatpush1.bf16.msra.mxu0 %v2258_v18  ;;  %646 = vmatpush1.bf16.msra.mxu1 %v2277_v24  ;;  %v3020_v59 = vld [vmem:[%s2877_s17 + $0xc4] ss:$16 sps:$4 sm:$0xff]   ;;  %v3023_v60 = vld [vmem:[%s2877_s17 + $0xcc] ss:$16 sps:$4 sm:$0xff]   ;;  %v3028_v61 = vld [vmem:[%s2877_s17 + $0xc0] ss:$16 sps:$4 sm:$0xff]  }
  0x92   : > { %604 = vmatprep.subr.bf16.mxu0 %v2260_v19  ;;  %647 = vmatprep.subr.bf16.mxu1 %v2278_v26  ;;  %v3031_v62 = vld [vmem:[%s2877_s17 + $0xc8] ss:$16 sps:$4 sm:$0xff]   ;;  %v3036_v63 = vld [vmem:[%s2877_s17 + $0xe4] ss:$16 sps:$4 sm:$0xff]   ;;  %v3039_v0 = vld [vmem:[%s2877_s17 + $0xec] ss:$16 sps:$4 sm:$0xff]  }
  0x93   : > { %v3044_v1 = vld [vmem:[%s2877_s17 + $0xe0] ss:$16 sps:$4 sm:$0xff]   ;;  %v3047_v2 = vld [vmem:[%s2877_s17 + $0xe8] ss:$16 sps:$4 sm:$0xff]   ;;  %v415_v5 = vshrl.u32 %v414_v4, 7  ;;  %p2130_p2 = scmp.ge.s32.totalorder %s2724_s25, 2 }
  0x94   : > { %v411_v7 = vld [vmem:[%s2883_s14] sm:$0xf]  ;;  %vm1793_vm0 = vcmask (!%p2130_p2), 1041408   ;;  %vm1795_vm1 = vcmask (!%p2130_p2), 1043456   ;;  %vm1797_vm2 = vcmask (!%p2130_p2), 1045504  }
  0x95   : > { %605 = vmatpush1.bf16.msra.mxu0 %v2264_v22  ;;  %648 = vmatpush1.bf16.msra.mxu1 %v2280_v28  ;;  %v416_v6 = vsub.s32 0, %v415_v5  ;;  %v420_v8 = vsub.s32 1, %v415_v5  ;;  %v424_v11 = vsub.s32 2, %v415_v5  ;;  %v428_v12 = vsub.s32 3, %v415_v5 }
  0x96   : > { %606 = vmatprep.subr.bf16.mxu0 %v2266_v23  ;;  %649 = vmatprep.subr.bf16.mxu1 %v2281_v29 }
  0x97   : > { %v417_v9 = vrot.slane %v411_v7, %v416_v6  ;;  %v421_v10 = vrot.slane %v411_v7, %v420_v8  ;;  %v425_v18 = vrot.slane %v411_v7, %v424_v11  ;;  %v429_v21 = vrot.slane %v411_v7, %v428_v12 }
  0x99   : > { %607 = vmatpush1.bf16.msra.mxu0 %v2270_v25  ;;  %650 = vmatpush1.bf16.msra.mxu1 %v2283_v31 }
  0x9a   : > { %608 = vmatprep.subr.bf16.mxu0 %v2272_v27  ;;  %651 = vmatprep.subr.bf16.mxu1 %v2284_v32 }
  0x9d   : > { %609 = vmatpush1.bf16.msra.mxu0 %v2276_v30  ;;  %652 = vmatpush1.bf16.msra.mxu1 %v2286_v34 }
  0x9e   : > { %881 = vmatprep.subr.bf16.mxu0 %v2926_v35  ;;  %922 = vmatprep.subr.bf16.mxu1 %v2929_v36 }
  0xa0   : > { %627 = vmatmul.mubr.bf16.vlgmr.msra.gmra.mrb[0].mxu0 %v412_v33  ;;  %670 = vmatmul.mubr.bf16.vlgmr.msra.gmra.mrb[0].mxu1 %v412_v33 }
  0xa1   : > { %913 = vmatprep.mubr.bf16.mxu0 %v2666_v3  ;;  %954 = vmatprep.mubr.bf16.mxu1 %v2666_v3 }
  0xa2   : > { %882 = vmatpush1.bf16.msra.mxu0 %v2932_v37  ;;  %923 = vmatpush1.bf16.msra.mxu1 %v2935_v38 }
  0xa3   : > { %883 = vmatprep.subr.bf16.mxu0 %v2938_v39  ;;  %924 = vmatprep.subr.bf16.mxu1 %v2941_v40 }
  0xa6   : > { %884 = vmatpush1.bf16.msra.mxu0 %v2948_v41  ;;  %925 = vmatpush1.bf16.msra.mxu1 %v2951_v42 }
  0xa7   : > { %885 = vmatprep.subr.bf16.mxu0 %v2956_v43  ;;  %926 = vmatprep.subr.bf16.mxu1 %v2959_v44 }
  0xaa   : > { %886 = vmatpush1.bf16.msra.mxu0 %v2964_v45  ;;  %927 = vmatpush1.bf16.msra.mxu1 %v2967_v46 }
  0xab   : > { %887 = vmatprep.subr.bf16.mxu0 %v2972_v47  ;;  %928 = vmatprep.subr.bf16.mxu1 %v2975_v48 }
  0xae   : > { %888 = vmatpush1.bf16.msra.mxu0 %v2980_v49  ;;  %929 = vmatpush1.bf16.msra.mxu1 %v2983_v50 }
  0xaf   : > { %889 = vmatprep.subr.bf16.mxu0 %v2988_v51  ;;  %930 = vmatprep.subr.bf16.mxu1 %v2991_v52 }
  0xb2   : > { %890 = vmatpush1.bf16.msra.mxu0 %v2996_v53  ;;  %931 = vmatpush1.bf16.msra.mxu1 %v2999_v54 }
  0xb3   : > { %891 = vmatprep.subr.bf16.mxu0 %v3004_v55  ;;  %932 = vmatprep.subr.bf16.mxu1 %v3007_v56 }
  0xb6   : > { %892 = vmatpush1.bf16.msra.mxu0 %v3012_v57  ;;  %933 = vmatpush1.bf16.msra.mxu1 %v3015_v58 }
  0xb7   : > { %893 = vmatprep.subr.bf16.mxu0 %v3020_v59  ;;  %934 = vmatprep.subr.bf16.mxu1 %v3023_v60 }
  0xba   : > { %894 = vmatpush1.bf16.msra.mxu0 %v3028_v61  ;;  %935 = vmatpush1.bf16.msra.mxu1 %v3031_v62 }
  0xbb   : > { %895 = vmatprep.subr.bf16.mxu0 %v3036_v63  ;;  %936 = vmatprep.subr.bf16.mxu1 %v3039_v0 }
  0xbe   : > { %896 = vmatpush1.bf16.msra.mxu0 %v3044_v1  ;;  %937 = vmatpush1.bf16.msra.mxu1 %v3047_v2 }
  0xbf   : > { %1014 = vmatprep.subr.bf16.mxu0 %v2926_v35  ;;  %1055 = vmatprep.subr.bf16.mxu1 %v2929_v36 }
 0x173   : > { %v628_v13 = vpop.f32.mrb[0].mxu0  ;;  %v671_v23 = vpop.f32.mrb[0].mxu1 }
 0x174   : > { %v629_v14 = vadd.f32 %v628_v13, %v417_v9  ;;  %v630_v15 = vpop.f32.mrb[1].mxu0  ;;  %v672_v24 = vadd.f32 %v671_v23, %v425_v18  ;;  %v673_v25 = vpop.f32.mrb[1].mxu1 }
 0x175   : > { %v631_v16 = vadd.f32 %v630_v15, %v421_v10  ;;  %v632_v17 = vpop.f32.mrb[2].mxu0  ;;  %v674_v26 = vadd.f32 %v673_v25, %v429_v21  ;;  %v675_v27 = vpop.f32.mrb[2].mxu1 }
 0x176   : > { %680 = vst [vmem:[#allocation3] sm:$0xff] %v629_v14  ;;  %v633_v19 = vadd.f32 %v632_v17, %v417_v9  ;;  %v634_v20 = vpop.f32.mrb[3].mxu0  ;;  %682 = vst [vmem:[#allocation3 + $0x10] sm:$0xff] %v672_v24  ;;  %v676_v28 = vadd.f32 %v675_v27, %v425_v18  ;;  %v677_v29 = vpop.f32.mrb[3].mxu1 }
 0x177   : > { %681 = vst [vmem:[#allocation3 + $0x8] sm:$0xff] %v631_v16  ;;  %v635_v22 = vadd.f32 %v634_v20, %v421_v10  ;;  %683 = vst [vmem:[#allocation3 + $0x18] sm:$0xff] %v674_v26  ;;  %v678_v30 = vadd.f32 %v677_v29, %v429_v21 }
 0x178   : > { %684 = vst [vmem:[#allocation3 + $0x20] sm:$0xff] %v633_v19  ;;  %686 = vst [vmem:[#allocation3 + $0x30] sm:$0xff] %v676_v28 }
 0x179   : > { %685 = vst [vmem:[#allocation3 + $0x28] sm:$0xff] %v635_v22  ;;  %687 = vst [vmem:[#allocation3 + $0x38] sm:$0xff] %v678_v30 }
 0x17d   : > { %v688_v31 = vld [vmem:[#allocation3] sm:$0x3]  ;;  %v690_v4 = vld [vmem:[#allocation3 + $0x10] sm:$0x3]  ;;  %v716_v28 = vld [vmem:[#allocation3] sm:$0xc] }
 0x17e   : > { %v2074_v32 = vmul.f32 -1.442695, %v688_v31  ;;  %v689_v33 = vld [vmem:[#allocation3 + $0x8] sm:$0x3]  ;;  %v2076_v5 = vmul.f32 -1.442695, %v690_v4 }
 0x17f   : > { %v2075_v34 = vmul.f32 -1.442695, %v689_v33  ;;  %v691_v6 = vld [vmem:[#allocation3 + $0x18] sm:$0x3]  ;;  %v717_v33 = vld [vmem:[#allocation3 + $0x8] sm:$0xc] }
 0x180   : > { %2335 = vpow2.f32 %v2074_v32 }
 0x181   : > { %2337 = vpow2.f32 %v2075_v34 }
 0x182   : > { %2339 = vpow2.f32 %v2076_v5 }
 0x183   : > { %2341 = vtanh.f32 %v691_v6 }
 0x18a   : > { %v2336_v7 = vpop.eup %2335 }
 0x18b   : > { %v2338_v8 = vpop.eup %2337  ;;  %v701_v9 = vadd.f32 1.0, %v2336_v7 }
 0x18c   : > { %v702_v10 = vadd.f32 1.0, %v2338_v8  ;;  %v2340_v11 = vpop.eup %2339 }
 0x18d   : > { %2343 = vrcp.f32 %v701_v9  ;;  %v2342_v12 = vpop.eup %2341  ;;  %v703_v14 = vadd.f32 1.0, %v2340_v11  ;;  %v718_v9 = vld [vmem:[#allocation3 + $0x10] sm:$0xc] }
 0x18e   : > { %2345 = vrcp.f32 %v702_v10 }
 0x18f   : > { %2347 = vrcp.f32 %v703_v14 }
 0x197   : > { %v2344_v13 = vpop.eup %2343 }
 0x198   : > { %v2346_v15 = vpop.eup %2345  ;;  %v712_v16 = vmul.f32 %v2344_v13, %v2342_v12  ;;  %v719_v12 = vld [vmem:[#allocation3 + $0x18] sm:$0xc] }
 0x199   : > { %v711_v17 = vmul.f32 0.0, %v2346_v15  ;;  %v2348_v19 = vpop.eup %2347 }
 0x19b   : > { %v3056_v18 = vadd.f32 %v712_v16, %v711_v17 }
 0x19d   : > { %2349 = vtanh.f32 %v3056_v18 }
 0x1a7   : > { %v2350_v20 = vpop.eup %2349 }
 0x1a8   : > { %v3059_v21 = vmul.f32 %v2350_v20, %v2348_v19 }
 0x1aa   : > { %v720_v22 = vpack.c.bf16 %v3059_v21, %v3059_v21 }
 0x1ac   : > { %914 = vmatmul.mubr.bf16.vlgmr.msra.gmra.mrb[4].mxu0 %v720_v22  ;;  %955 = vmatmul.mubr.bf16.vlgmr.msra.gmra.mrb[4].mxu1 %v720_v22 }
 0x1ad   : > { %1015 = vmatpush1.bf16.msra.mxu0 %v2932_v37  ;;  %1056 = vmatpush1.bf16.msra.mxu1 %v2935_v38 }
 0x1ae   : > { %1016 = vmatprep.subr.bf16.mxu0 %v2938_v39  ;;  %1057 = vmatprep.subr.bf16.mxu1 %v2941_v40 }
 0x1af   : > { %1046 = vmatprep.mubr.bf16.mxu0 %v2666_v3  ;;  %1087 = vmatprep.mubr.bf16.mxu1 %v2666_v3 }
 0x1b1   : > { %1017 = vmatpush1.bf16.msra.mxu0 %v2948_v41  ;;  %1058 = vmatpush1.bf16.msra.mxu1 %v2951_v42 }
 0x1b2   : > { %1018 = vmatprep.subr.bf16.mxu0 %v2956_v43  ;;  %1059 = vmatprep.subr.bf16.mxu1 %v2959_v44 }
 0x1b5   : > { %1019 = vmatpush1.bf16.msra.mxu0 %v2964_v45  ;;  %1060 = vmatpush1.bf16.msra.mxu1 %v2967_v46 }
 0x1b6   : > { %1020 = vmatprep.subr.bf16.mxu0 %v2972_v47  ;;  %1061 = vmatprep.subr.bf16.mxu1 %v2975_v48 }
 0x1b9   : > { %1021 = vmatpush1.bf16.msra.mxu0 %v2980_v49  ;;  %1062 = vmatpush1.bf16.msra.mxu1 %v2983_v50 }
 0x1ba   : > { %1022 = vmatprep.subr.bf16.mxu0 %v2988_v51  ;;  %1063 = vmatprep.subr.bf16.mxu1 %v2991_v52 }
 0x1bd   : > { %1023 = vmatpush1.bf16.msra.mxu0 %v2996_v53  ;;  %1064 = vmatpush1.bf16.msra.mxu1 %v2999_v54 }
 0x1be   : > { %1024 = vmatprep.subr.bf16.mxu0 %v3004_v55  ;;  %1065 = vmatprep.subr.bf16.mxu1 %v3007_v56 }
 0x1c1   : > { %1025 = vmatpush1.bf16.msra.mxu0 %v3012_v57  ;;  %1066 = vmatpush1.bf16.msra.mxu1 %v3015_v58 }
 0x1c2   : > { %1026 = vmatprep.subr.bf16.mxu0 %v3020_v59  ;;  %1067 = vmatprep.subr.bf16.mxu1 %v3023_v60 }
 0x1c5   : > { %1027 = vmatpush1.bf16.msra.mxu0 %v3028_v61  ;;  %1068 = vmatpush1.bf16.msra.mxu1 %v3031_v62 }
 0x1c6   : > { %1028 = vmatprep.subr.bf16.mxu0 %v3036_v63  ;;  %1069 = vmatprep.subr.bf16.mxu1 %v3039_v0 }
 0x1c9   : > { %1029 = vmatpush1.bf16.msra.mxu0 %v3044_v1  ;;  %1070 = vmatpush1.bf16.msra.mxu1 %v3047_v2 }
 0x1ca   : > { %1147 = vmatprep.subr.bf16.mxu0 %v2926_v35  ;;  %1188 = vmatprep.subr.bf16.mxu1 %v2929_v36 }
 0x27f   : > { %v915_v23 = vpop.f32.mrb[4].mxu0  ;;  %v956_v24 = vpop.f32.mrb[4].mxu1 }
 0x280   : > { %v967_v25 = vrot.slane %v915_v23, 6  ;;  %v917_v26 = vpop.f32.mrb[5].mxu0  ;;  %v958_v27 = vpop.f32.mrb[5].mxu1  ;;  %v969_v8 = vrot.slane %v956_v24, 6  ;;  %v999_v24 = vrot.slane %v3056_v18, 6 }
 0x281   : > { %v968_v29 = vrot.slane %v917_v26, 6  ;;  %v919_v30 = vpop.f32.mrb[6].mxu0  ;;  %v960_v31 = vpop.f32.mrb[6].mxu1  ;;  %v970_v10 = vrot.slane %v958_v27, 6 }
 0x282   : > { %v975_v32 = vadd.f32 %v967_v25, %v716_v28  ;;  %v920_v34 = vpop.f32.mrb[7].mxu0  ;;  %v961_v4 = vpop.f32.mrb[7].mxu1  ;;  %v977_v11 = vadd.f32 %v969_v8, %v718_v9  ;;  %v1006_v8 = vld [vmem:[#allocation3] sm:$0x30] }
 0x283   : > { %v976_v5 = vadd.f32 %v968_v29, %v717_v33  ;;  %v978_v13 = vadd.f32 %v970_v10, %v719_v12 }
 0x284   : > { %v2109_v6 = vmul.f32 -1.442695, %v975_v32  ;;  %v2111_v14 = vmul.f32 -1.442695, %v977_v11 }
 0x285   : > { %v2110_v7 = vmul.f32 -1.442695, %v976_v5 }
 0x286   : > { %2351 = vpow2.f32 %v2109_v6 }
 0x287   : > { %2353 = vpow2.f32 %v2110_v7 }
 0x288   : > { %2355 = vtanh.f32 %v978_v13  ;;  %v1007_v13 = vld [vmem:[#allocation3 + $0x8] sm:$0x30] }
 0x289   : > { %2357 = vpow2.f32 %v2111_v14 }
 0x290   : > { %v2352_v15 = vpop.eup %2351 }
 0x291   : > { %v988_v16 = vadd.f32 1.0, %v2352_v15  ;;  %v2354_v17 = vpop.eup %2353 }
 0x292   : > { %v989_v19 = vadd.f32 1.0, %v2354_v17  ;;  %v2356_v20 = vpop.eup %2355 }
 0x293   : > { %2359 = vrcp.f32 %v988_v16  ;;  %v2358_v22 = vpop.eup %2357 }
 0x294   : > { %2361 = vrcp.f32 %v989_v19  ;;  %v990_v27 = vadd.f32 1.0, %v2358_v22  ;;  %v1008_v22 = vld [vmem:[#allocation3 + $0x10] sm:$0x30] }
 0x296   : > { %2363 = vrcp.f32 %v990_v27 }
 0x29d   : > { %v2360_v23 = vpop.eup %2359 }
 0x29e   : > { %v1002_v25 = vmul.f32 %v2360_v23, %v2356_v20  ;;  %v2362_v26 = vpop.eup %2361 }
 0x29f   : > { %v1001_v28 = vmul.f32 %v2362_v26, %v999_v24 }
 0x2a0   : > { %v2364_v30 = vpop.eup %2363 }
 0x2a1   : > { %v3098_v29 = vadd.f32 %v1002_v25, %v1001_v28  ;;  %v1009_v25 = vld [vmem:[#allocation3 + $0x18] sm:$0x30] }
 0x2a3   : > { %2365 = vtanh.f32 %v3098_v29 }
 0x2ad   : > { %v2366_v31 = vpop.eup %2365 }
 0x2ae   : > { %v3101_v32 = vmul.f32 %v2366_v31, %v2364_v30 }
 0x2b0   : > { %v1010_v33 = vpack.c.bf16 %v3101_v32, %v3101_v32 }
 0x2b2   : > { %v1012_v34 = vrot.slane %v1010_v33, 1 }
 0x2b4   : > { %1047 = vmatmul.mubr.bf16.vlgmr.msra.gmra.mrb[8].mxu0 %v1012_v34  ;;  %1088 = vmatmul.mubr.bf16.vlgmr.msra.gmra.mrb[8].mxu1 %v1012_v34 }
 0x2b5   : > { %1148 = vmatpush1.bf16.msra.mxu0 %v2932_v37  ;;  %1189 = vmatpush1.bf16.msra.mxu1 %v2935_v38 }
 0x2b6   : > { %1149 = vmatprep.subr.bf16.mxu0 %v2938_v39  ;;  %1190 = vmatprep.subr.bf16.mxu1 %v2941_v40 }
 0x2b7   : > { %1179 = vmatprep.mubr.bf16.mxu0 %v2666_v3  ;;  %1220 = vmatprep.mubr.bf16.mxu1 %v2666_v3 }
 0x2b9   : > { %1150 = vmatpush1.bf16.msra.mxu0 %v2948_v41  ;;  %1191 = vmatpush1.bf16.msra.mxu1 %v2951_v42 }
 0x2ba   : > { %1151 = vmatprep.subr.bf16.mxu0 %v2956_v43  ;;  %1192 = vmatprep.subr.bf16.mxu1 %v2959_v44 }
 0x2bd   : > { %1152 = vmatpush1.bf16.msra.mxu0 %v2964_v45  ;;  %1193 = vmatpush1.bf16.msra.mxu1 %v2967_v46 }
 0x2be   : > { %1153 = vmatprep.subr.bf16.mxu0 %v2972_v47  ;;  %1194 = vmatprep.subr.bf16.mxu1 %v2975_v48 }
 0x2c1   : > { %1154 = vmatpush1.bf16.msra.mxu0 %v2980_v49  ;;  %1195 = vmatpush1.bf16.msra.mxu1 %v2983_v50 }
 0x2c2   : > { %1155 = vmatprep.subr.bf16.mxu0 %v2988_v51  ;;  %1196 = vmatprep.subr.bf16.mxu1 %v2991_v52 }
 0x2c5   : > { %1156 = vmatpush1.bf16.msra.mxu0 %v2996_v53  ;;  %1197 = vmatpush1.bf16.msra.mxu1 %v2999_v54 }
 0x2c6   : > { %1157 = vmatprep.subr.bf16.mxu0 %v3004_v55  ;;  %1198 = vmatprep.subr.bf16.mxu1 %v3007_v56 }
 0x2c9   : > { %1158 = vmatpush1.bf16.msra.mxu0 %v3012_v57  ;;  %1199 = vmatpush1.bf16.msra.mxu1 %v3015_v58 }
 0x2ca   : > { %1159 = vmatprep.subr.bf16.mxu0 %v3020_v59  ;;  %1200 = vmatprep.subr.bf16.mxu1 %v3023_v60 }
 0x2cd   : > { %1160 = vmatpush1.bf16.msra.mxu0 %v3028_v61  ;;  %1201 = vmatpush1.bf16.msra.mxu1 %v3031_v62 }
 0x2ce   : > { %1161 = vmatprep.subr.bf16.mxu0 %v3036_v63  ;;  %1202 = vmatprep.subr.bf16.mxu1 %v3039_v0 }
 0x2d1   : > { %1162 = vmatpush1.bf16.msra.mxu0 %v3044_v1  ;;  %1203 = vmatpush1.bf16.msra.mxu1 %v3047_v2 }
 0x2d2   : > { %1280 = vmatprep.subr.bf16.mxu0 %v2926_v35  ;;  %1321 = vmatprep.subr.bf16.mxu1 %v2929_v36 }
 0x387   : > { %v1048_v18 = vpop.f32.mrb[8].mxu0  ;;  %v1089_v4 = vpop.f32.mrb[8].mxu1 }
 0x388   : > { %v1100_v5 = vrot.slane %v1048_v18, 4  ;;  %v1050_v6 = vpop.f32.mrb[9].mxu0  ;;  %v1091_v7 = vpop.f32.mrb[9].mxu1  ;;  %v1102_v20 = vrot.slane %v1089_v4, 4  ;;  %v1132_v4 = vrot.slane %v3098_v29, 6 }
 0x389   : > { %v1101_v9 = vrot.slane %v1050_v6, 4  ;;  %v1052_v10 = vpop.f32.mrb[10].mxu0  ;;  %v1093_v11 = vpop.f32.mrb[10].mxu1  ;;  %v1103_v23 = vrot.slane %v1091_v7, 4 }
 0x38a   : > { %v1108_v12 = vadd.f32 %v1100_v5, %v1006_v8  ;;  %v1053_v14 = vpop.f32.mrb[11].mxu0  ;;  %v1094_v15 = vpop.f32.mrb[11].mxu1  ;;  %v1110_v24 = vadd.f32 %v1102_v20, %v1008_v22  ;;  %v1139_v22 = vld [vmem:[#allocation3] sm:$0xc0] }
 0x38b   : > { %v1109_v16 = vadd.f32 %v1101_v9, %v1007_v13  ;;  %v1111_v26 = vadd.f32 %v1103_v23, %v1009_v25 }
 0x38c   : > { %v2112_v17 = vmul.f32 -1.442695, %v1108_v12  ;;  %v2114_v27 = vmul.f32 -1.442695, %v1110_v24 }
 0x38d   : > { %v2113_v19 = vmul.f32 -1.442695, %v1109_v16 }
 0x38e   : > { %2367 = vpow2.f32 %v2112_v17 }
 0x38f   : > { %2369 = vpow2.f32 %v2113_v19 }
 0x390   : > { %2371 = vtanh.f32 %v1111_v26 }
 0x391   : > { %2373 = vpow2.f32 %v2114_v27  ;;  %v1140_v27 = vld [vmem:[#allocation3 + $0x8] sm:$0xc0] }
 0x398   : > { %v2368_v28 = vpop.eup %2367 }
 0x399   : > { %v1121_v30 = vadd.f32 1.0, %v2368_v28  ;;  %v2370_v31 = vpop.eup %2369 }
 0x39a   : > { %v1122_v33 = vadd.f32 1.0, %v2370_v31  ;;  %v2372_v34 = vpop.eup %2371 }
 0x39b   : > { %2375 = vrcp.f32 %v1121_v30  ;;  %v2374_v18 = vpop.eup %2373 }
 0x39c   : > { %2377 = vrcp.f32 %v1122_v33  ;;  %v1123_v7 = vadd.f32 1.0, %v2374_v18 }
 0x39e   : > { %2379 = vrcp.f32 %v1123_v7 }
 0x3a5   : > { %v2376_v5 = vpop.eup %2375 }
 0x3a6   : > { %v1135_v6 = vmul.f32 %v2376_v5, %v2372_v34  ;;  %v2378_v8 = vpop.eup %2377  ;;  %v1141_v5 = vld [vmem:[#allocation3 + $0x10] sm:$0xc0] }
 0x3a7   : > { %v1134_v9 = vmul.f32 %v2378_v8, %v1132_v4  ;;  %v1142_v8 = vld [vmem:[#allocation3 + $0x18] sm:$0xc0] }
 0x3a8   : > { %v2380_v11 = vpop.eup %2379 }
 0x3a9   : > { %v3140_v10 = vadd.f32 %v1135_v6, %v1134_v9 }
 0x3ab   : > { %2381 = vtanh.f32 %v3140_v10 }
 0x3b5   : > { %v2382_v12 = vpop.eup %2381 }
 0x3b6   : > { %v3143_v13 = vmul.f32 %v2382_v12, %v2380_v11 }
 0x3b8   : > { %v1143_v14 = vpack.c.bf16 %v3143_v13, %v3143_v13 }
 0x3ba   : > { %v1145_v15 = vrot.slane %v1143_v14, 2 }
 0x3bc   : > { %1180 = vmatmul.mubr.bf16.vlgmr.msra.gmra.mrb[12].mxu0 %v1145_v15  ;;  %1221 = vmatmul.mubr.bf16.vlgmr.msra.gmra.mrb[12].mxu1 %v1145_v15 }
 0x3bd   : > { %1281 = vmatpush1.bf16.msra.mxu0 %v2932_v37  ;;  %1322 = vmatpush1.bf16.msra.mxu1 %v2935_v38 }
 0x3be   : > { %1282 = vmatprep.subr.bf16.mxu0 %v2938_v39  ;;  %1323 = vmatprep.subr.bf16.mxu1 %v2941_v40 }
 0x3bf   : > { %1312 = vmatprep.mubr.bf16.mxu0 %v2666_v3  ;;  %1353 = vmatprep.mubr.bf16.mxu1 %v2666_v3 }
 0x3c1   : > { %1283 = vmatpush1.bf16.msra.mxu0 %v2948_v41  ;;  %1324 = vmatpush1.bf16.msra.mxu1 %v2951_v42 }
 0x3c2   : > { %1284 = vmatprep.subr.bf16.mxu0 %v2956_v43  ;;  %1325 = vmatprep.subr.bf16.mxu1 %v2959_v44 }
 0x3c5   : > { %1285 = vmatpush1.bf16.msra.mxu0 %v2964_v45  ;;  %1326 = vmatpush1.bf16.msra.mxu1 %v2967_v46 }
 0x3c6   : > { %1286 = vmatprep.subr.bf16.mxu0 %v2972_v47  ;;  %1327 = vmatprep.subr.bf16.mxu1 %v2975_v48 }
 0x3c9   : > { %1287 = vmatpush1.bf16.msra.mxu0 %v2980_v49  ;;  %1328 = vmatpush1.bf16.msra.mxu1 %v2983_v50 }
 0x3ca   : > { %1288 = vmatprep.subr.bf16.mxu0 %v2988_v51  ;;  %1329 = vmatprep.subr.bf16.mxu1 %v2991_v52 }
 0x3cd   : > { %1289 = vmatpush1.bf16.msra.mxu0 %v2996_v53  ;;  %1330 = vmatpush1.bf16.msra.mxu1 %v2999_v54 }
 0x3ce   : > { %1290 = vmatprep.subr.bf16.mxu0 %v3004_v55  ;;  %1331 = vmatprep.subr.bf16.mxu1 %v3007_v56 }
 0x3d1   : > { %1291 = vmatpush1.bf16.msra.mxu0 %v3012_v57  ;;  %1332 = vmatpush1.bf16.msra.mxu1 %v3015_v58 }
 0x3d2   : > { %1292 = vmatprep.subr.bf16.mxu0 %v3020_v59  ;;  %1333 = vmatprep.subr.bf16.mxu1 %v3023_v60 }
 0x3d5   : > { %1293 = vmatpush1.bf16.msra.mxu0 %v3028_v61  ;;  %1334 = vmatpush1.bf16.msra.mxu1 %v3031_v62 }
 0x3d6   : > { %1294 = vmatprep.subr.bf16.mxu0 %v3036_v63  ;;  %1335 = vmatprep.subr.bf16.mxu1 %v3039_v0 }
 0x3d9   : > { %1295 = vmatpush1.bf16.msra.mxu0 %v3044_v1  ;;  %1336 = vmatpush1.bf16.msra.mxu1 %v3047_v2 }
 0x3da   : > { %1398 = vmatprep.subr.bf16.mxu0 %v2926_v35  ;;  %1439 = vmatprep.subr.bf16.mxu1 %v2929_v36 }
 0x48f   : > { %v1181_v29 = vpop.f32.mrb[12].mxu0  ;;  %v1222_v16 = vpop.f32.mrb[12].mxu1 }
 0x490   : > { %v1233_v17 = vrot.slane %v1181_v29, 2  ;;  %v1183_v19 = vpop.f32.mrb[13].mxu0  ;;  %v1224_v20 = vpop.f32.mrb[13].mxu1  ;;  %v1235_v18 = vrot.slane %v1222_v16, 2  ;;  %v1265_v16 = vrot.slane %v3140_v10, 6 }
 0x491   : > { %v1234_v23 = vrot.slane %v1183_v19, 2  ;;  %v1185_v24 = vpop.f32.mrb[14].mxu0  ;;  %v1226_v25 = vpop.f32.mrb[14].mxu1  ;;  %v1236_v4 = vrot.slane %v1224_v20, 2  ;;  %v1272_v10 = vld [vmem:[#allocation3 + $0x20] sm:$0x3] }
 0x492   : > { %v1241_v26 = vadd.f32 %v1233_v17, %v1139_v22  ;;  %v1186_v28 = vpop.f32.mrb[15].mxu0  ;;  %v1227_v30 = vpop.f32.mrb[15].mxu1  ;;  %v1243_v6 = vadd.f32 %v1235_v18, %v1141_v5  ;;  %v1273_v5 = vld [vmem:[#allocation3 + $0x28] sm:$0x3] }
 0x493   : > { %v1242_v31 = vadd.f32 %v1234_v23, %v1140_v27  ;;  %v1244_v7 = vadd.f32 %v1236_v4, %v1142_v8 }
 0x494   : > { %v2115_v33 = vmul.f32 -1.442695, %v1241_v26  ;;  %v2117_v9 = vmul.f32 -1.442695, %v1243_v6 }
 0x495   : > { %v2116_v34 = vmul.f32 -1.442695, %v1242_v31 }
 0x496   : > { %2383 = vpow2.f32 %v2115_v33 }
 0x497   : > { %2385 = vpow2.f32 %v2116_v34 }
 0x498   : > { %2387 = vtanh.f32 %v1244_v7 }
 0x499   : > { %2389 = vpow2.f32 %v2117_v9 }
 0x4a0   : > { %v2384_v11 = vpop.eup %2383 }
 0x4a1   : > { %v1254_v12 = vadd.f32 1.0, %v2384_v11  ;;  %v2386_v14 = vpop.eup %2385 }
 0x4a2   : > { %v1255_v15 = vadd.f32 1.0, %v2386_v14  ;;  %v2388_v29 = vpop.eup %2387 }
 0x4a3   : > { %2391 = vrcp.f32 %v1254_v12  ;;  %v2390_v17 = vpop.eup %2389 }
 0x4a4   : > { %2393 = vrcp.f32 %v1255_v15  ;;  %v1256_v20 = vadd.f32 1.0, %v2390_v17 }
 0x4a6   : > { %2395 = vrcp.f32 %v1256_v20 }
 0x4ad   : > { %v2392_v19 = vpop.eup %2391 }
 0x4ae   : > { %v1268_v22 = vmul.f32 %v2392_v19, %v2388_v29  ;;  %v2394_v23 = vpop.eup %2393  ;;  %v1274_v29 = vld [vmem:[#allocation3 + $0x30] sm:$0x3]  ;;  %v1275_v19 = vld [vmem:[#allocation3 + $0x38] sm:$0x3] }
 0x4af   : > { %v1267_v24 = vmul.f32 %v2394_v23, %v1265_v16 }
 0x4b0   : > { %v2396_v26 = vpop.eup %2395 }
 0x4b1   : > { %v3182_v25 = vadd.f32 %v1268_v22, %v1267_v24 }
 0x4b3   : > { %2397 = vtanh.f32 %v3182_v25 }
 0x4bd   : > { %v2398_v27 = vpop.eup %2397 }
 0x4be   : > { %v3185_v28 = vmul.f32 %v2398_v27, %v2396_v26 }
 0x4c0   : > { %v1276_v30 = vpack.c.bf16 %v3185_v28, %v3185_v28 }
 0x4c2   : > { %v1278_v31 = vrot.slane %v1276_v30, 3 }
 0x4c4   : > { %1313 = vmatmul.mubr.bf16.vlgmr.msra.gmra.mrb[16].mxu0 %v1278_v31  ;;  %1354 = vmatmul.mubr.bf16.vlgmr.msra.gmra.mrb[16].mxu1 %v1278_v31 }
 0x4c5   : > { %1399 = vmatpush1.bf16.msra.mxu0 %v2932_v37  ;;  %1440 = vmatpush1.bf16.msra.mxu1 %v2935_v38 }
 0x4c6   : > { %1400 = vmatprep.subr.bf16.mxu0 %v2938_v39  ;;  %1441 = vmatprep.subr.bf16.mxu1 %v2941_v40 }
 0x4c7   : > { %1430 = vmatprep.mubr.bf16.mxu0 %v2666_v3  ;;  %1471 = vmatprep.mubr.bf16.mxu1 %v2666_v3 }
 0x4c9   : > { %1401 = vmatpush1.bf16.msra.mxu0 %v2948_v41  ;;  %1442 = vmatpush1.bf16.msra.mxu1 %v2951_v42 }
 0x4ca   : > { %1402 = vmatprep.subr.bf16.mxu0 %v2956_v43  ;;  %1443 = vmatprep.subr.bf16.mxu1 %v2959_v44 }
 0x4cd   : > { %1403 = vmatpush1.bf16.msra.mxu0 %v2964_v45  ;;  %1444 = vmatpush1.bf16.msra.mxu1 %v2967_v46 }
 0x4ce   : > { %1404 = vmatprep.subr.bf16.mxu0 %v2972_v47  ;;  %1445 = vmatprep.subr.bf16.mxu1 %v2975_v48 }
 0x4d1   : > { %1405 = vmatpush1.bf16.msra.mxu0 %v2980_v49  ;;  %1446 = vmatpush1.bf16.msra.mxu1 %v2983_v50 }
 0x4d2   : > { %1406 = vmatprep.subr.bf16.mxu0 %v2988_v51  ;;  %1447 = vmatprep.subr.bf16.mxu1 %v2991_v52 }
 0x4d5   : > { %1407 = vmatpush1.bf16.msra.mxu0 %v2996_v53  ;;  %1448 = vmatpush1.bf16.msra.mxu1 %v2999_v54 }
 0x4d6   : > { %1408 = vmatprep.subr.bf16.mxu0 %v3004_v55  ;;  %1449 = vmatprep.subr.bf16.mxu1 %v3007_v56 }
 0x4d9   : > { %1409 = vmatpush1.bf16.msra.mxu0 %v3012_v57  ;;  %1450 = vmatpush1.bf16.msra.mxu1 %v3015_v58 }
 0x4da   : > { %1410 = vmatprep.subr.bf16.mxu0 %v3020_v59  ;;  %1451 = vmatprep.subr.bf16.mxu1 %v3023_v60 }
 0x4dd   : > { %1411 = vmatpush1.bf16.msra.mxu0 %v3028_v61  ;;  %1452 = vmatpush1.bf16.msra.mxu1 %v3031_v62 }
 0x4de   : > { %1412 = vmatprep.subr.bf16.mxu0 %v3036_v63  ;;  %1453 = vmatprep.subr.bf16.mxu1 %v3039_v0 }
 0x4e1   : > { %1413 = vmatpush1.bf16.msra.mxu0 %v3044_v1  ;;  %1454 = vmatpush1.bf16.msra.mxu1 %v3047_v2 }
 0x4e2   : > { %1531 = vmatprep.subr.bf16.mxu0 %v2926_v35  ;;  %1572 = vmatprep.subr.bf16.mxu1 %v2929_v36 }
 0x597   : > { %v1314_v33 = vpop.f32.mrb[16].mxu0  ;;  %v1355_v34 = vpop.f32.mrb[16].mxu1 }
 0x598   : > { %v1362_v18 = vadd.f32 %v1314_v33, %v1272_v10  ;;  %v1316_v4 = vpop.f32.mrb[17].mxu0  ;;  %v1357_v6 = vpop.f32.mrb[17].mxu1  ;;  %v1364_v17 = vadd.f32 %v1355_v34, %v1274_v29  ;;  %v1386_v10 = vrot.slane %v3182_v25, 6 }
 0x599   : > { %v1363_v8 = vadd.f32 %v1316_v4, %v1273_v5  ;;  %v1318_v7 = vpop.f32.mrb[18].mxu0  ;;  %v1359_v9 = vpop.f32.mrb[18].mxu1  ;;  %v1365_v16 = vadd.f32 %v1357_v6, %v1275_v19 }
 0x59a   : > { %v2118_v11 = vmul.f32 -1.442695, %v1362_v18  ;;  %v1319_v12 = vpop.f32.mrb[19].mxu0  ;;  %v1360_v14 = vpop.f32.mrb[19].mxu1  ;;  %v2120_v22 = vmul.f32 -1.442695, %v1364_v17 }
 0x59b   : > { %v2119_v15 = vmul.f32 -1.442695, %v1363_v8 }
 0x59c   : > { %2399 = vpow2.f32 %v2118_v11 }
 0x59d   : > { %2401 = vpow2.f32 %v2119_v15 }
 0x59e   : > { %2403 = vtanh.f32 %v1365_v16 }
 0x59f   : > { %2405 = vpow2.f32 %v2120_v22  ;;  %v2463_v22 = vld [vmem:[%s2877_s17] ss:$16 sps:$4 sm:$0xff]  }
 0x5a6   : > { %v2400_v23 = vpop.eup %2399 }
 0x5a7   : > { %v1375_v20 = vadd.f32 1.0, %v2400_v23  ;;  %v2402_v24 = vpop.eup %2401  ;;  %v2464_v23 = vld [vmem:[%s2877_s17 + $0x8] ss:$16 sps:$4 sm:$0xff]  }
 0x5a8   : > { %v1376_v26 = vadd.f32 1.0, %v2402_v24  ;;  %v2404_v27 = vpop.eup %2403  ;;  %v2466_v24 = vld [vmem:[%s2877_s17 + $0x2c] ss:$16 sps:$4 sm:$0xff]  }
 0x5a9   : > { %2407 = vrcp.f32 %v1375_v20  ;;  %v2406_v30 = vpop.eup %2405  ;;  %v2465_v20 = vld [vmem:[%s2877_s17 + $0x24] ss:$16 sps:$4 sm:$0xff]  }
 0x5aa   : > { %2409 = vrcp.f32 %v1376_v26  ;;  %v1377_v5 = vadd.f32 1.0, %v2406_v30  ;;  %v2467_v26 = vld [vmem:[%s2877_s17 + $0x20] ss:$16 sps:$4 sm:$0xff]   ;;  %v2469_v30 = vld [vmem:[%s2877_s17 + $0x44] ss:$16 sps:$4 sm:$0xff]  }
 0x5ac   : > { %2411 = vrcp.f32 %v1377_v5  ;;  %v2475_v5 = vld [vmem:[%s2877_s17 + $0x60] ss:$16 sps:$4 sm:$0xff]  }
 0x5b3   : > { %v2408_v31 = vpop.eup %2407 }
 0x5b4   : > { %v1389_v33 = vmul.f32 %v2408_v31, %v2404_v27  ;;  %v2410_v18 = vpop.eup %2409  ;;  %v2468_v27 = vld [vmem:[%s2877_s17 + $0x28] ss:$16 sps:$4 sm:$0xff]   ;;  %v2470_v31 = vld [vmem:[%s2877_s17 + $0x4c] ss:$16 sps:$4 sm:$0xff]  }
 0x5b5   : > { %v1388_v34 = vmul.f32 %v2410_v18, %v1386_v10  ;;  %v2471_v10 = vld [vmem:[%s2877_s17 + $0x40] ss:$16 sps:$4 sm:$0xff]   ;;  %v2473_v18 = vld [vmem:[%s2877_s17 + $0x64] ss:$16 sps:$4 sm:$0xff]  }
 0x5b6   : > { %v2412_v6 = vpop.eup %2411 }
 0x5b7   : > { %v3224_v4 = vadd.f32 %v1389_v33, %v1388_v34  ;;  %v2472_v33 = vld [vmem:[%s2877_s17 + $0x48] ss:$16 sps:$4 sm:$0xff]  }
 0x5b8   : > { %v2476_v34 = vld [vmem:[%s2877_s17 + $0x68] ss:$16 sps:$4 sm:$0xff]  }
 0x5b9   : > { %2413 = vtanh.f32 %v3224_v4 }
 0x5c3   : > { %v2414_v8 = vpop.eup %2413 }
 0x5c4   : > { %v3227_v7 = vmul.f32 %v2414_v8, %v2412_v6  ;;  %v2478_v6 = vld [vmem:[%s2877_s17 + $0x8c] ss:$16 sps:$4 sm:$0xff]   ;;  %v2479_v8 = vld [vmem:[%s2877_s17 + $0x80] ss:$16 sps:$4 sm:$0xff]  }
 0x5c6   : > { %v1397_v9 = vpack.c.bf16 %v3227_v7, %v3227_v7 }
 0x5c8   : > { %1431 = vmatmul.mubr.bf16.vlgmr.msra.gmra.mrb[20].mxu0 %v1397_v9  ;;  %1472 = vmatmul.mubr.bf16.vlgmr.msra.gmra.mrb[20].mxu1 %v1397_v9  ;;  %v2480_v9 = vld [vmem:[%s2877_s17 + $0x88] ss:$16 sps:$4 sm:$0xff]  }
 0x5c9   : > { %1532 = vmatpush1.bf16.msra.mxu0 %v2932_v37  ;;  %1573 = vmatpush1.bf16.msra.mxu1 %v2935_v38 }
 0x5ca   : > { %1533 = vmatprep.subr.bf16.mxu0 %v2938_v39  ;;  %1574 = vmatprep.subr.bf16.mxu1 %v2941_v40 }
 0x5cb   : > { %1563 = vmatprep.mubr.bf16.mxu0 %v2666_v3  ;;  %1604 = vmatprep.mubr.bf16.mxu1 %v2666_v3 }
 0x5cd   : > { %1534 = vmatpush1.bf16.msra.mxu0 %v2948_v41  ;;  %1575 = vmatpush1.bf16.msra.mxu1 %v2951_v42  ;;  %v1393_v42 = vld [vmem:[#allocation3 + $0x20] sm:$0xc] }
 0x5ce   : > { %1535 = vmatprep.subr.bf16.mxu0 %v2956_v43  ;;  %1576 = vmatprep.subr.bf16.mxu1 %v2959_v44 }
 0x5d1   : > { %1536 = vmatpush1.bf16.msra.mxu0 %v2964_v45  ;;  %1577 = vmatpush1.bf16.msra.mxu1 %v2967_v46 }
 0x5d2   : > { %1537 = vmatprep.subr.bf16.mxu0 %v2972_v47  ;;  %1578 = vmatprep.subr.bf16.mxu1 %v2975_v48  ;;  %v1394_v47 = vld [vmem:[#allocation3 + $0x28] sm:$0xc] }
 0x5d5   : > { %1538 = vmatpush1.bf16.msra.mxu0 %v2980_v49  ;;  %1579 = vmatpush1.bf16.msra.mxu1 %v2983_v50 }
 0x5d6   : > { %1539 = vmatprep.subr.bf16.mxu0 %v2988_v51  ;;  %1580 = vmatprep.subr.bf16.mxu1 %v2991_v52 }
 0x5d9   : > { %1540 = vmatpush1.bf16.msra.mxu0 %v2996_v53  ;;  %1581 = vmatpush1.bf16.msra.mxu1 %v2999_v54 }
 0x5da   : > { %1541 = vmatprep.subr.bf16.mxu0 %v3004_v55  ;;  %1582 = vmatprep.subr.bf16.mxu1 %v3007_v56  ;;  %v1396_v55 = vld [vmem:[#allocation3 + $0x38] sm:$0xc] }
 0x5dd   : > { %1542 = vmatpush1.bf16.msra.mxu0 %v3012_v57  ;;  %1583 = vmatpush1.bf16.msra.mxu1 %v3015_v58 }
 0x5de   : > { %1543 = vmatprep.subr.bf16.mxu0 %v3020_v59  ;;  %1584 = vmatprep.subr.bf16.mxu1 %v3023_v60 }
 0x5e1   : > { %1544 = vmatpush1.bf16.msra.mxu0 %v3028_v61  ;;  %1585 = vmatpush1.bf16.msra.mxu1 %v3031_v62 }
 0x5e2   : > { %1545 = vmatprep.subr.bf16.mxu0 %v3036_v63  ;;  %1586 = vmatprep.subr.bf16.mxu1 %v3039_v0 }
 0x5e5   : > { %1546 = vmatpush1.bf16.msra.mxu0 %v3044_v1  ;;  %1587 = vmatpush1.bf16.msra.mxu1 %v3047_v2  ;;  %v1516_v1 = vrot.slane %v3224_v4, 6  ;;  %v2477_v4 = vld [vmem:[%s2877_s17 + $0x84] ss:$16 sps:$4 sm:$0xff]  }
 0x5e6   : > { %1664 = vmatprep.subr.bf16.mxu0 %v2926_v35  ;;  %1705 = vmatprep.subr.bf16.mxu1 %v2929_v36  ;;  %v1395_v36 = vld [vmem:[#allocation3 + $0x30] sm:$0xc] }
 0x69b   : > { %v1432_v37 = vpop.f32.mrb[20].mxu0  ;;  %v1473_v38 = vpop.f32.mrb[20].mxu1 }
 0x69c   : > { %v1484_v39 = vrot.slane %v1432_v37, 6  ;;  %v1434_v40 = vpop.f32.mrb[21].mxu0  ;;  %v1475_v41 = vpop.f32.mrb[21].mxu1  ;;  %v1486_v35 = vrot.slane %v1473_v38, 6  ;;  %v2481_v37 = vld [vmem:[%s2877_s17 + $0xa4] ss:$16 sps:$4 sm:$0xff]  }
 0x69d   : > { %v1485_v43 = vrot.slane %v1434_v40, 6  ;;  %v1436_v44 = vpop.f32.mrb[22].mxu0  ;;  %v1477_v45 = vpop.f32.mrb[22].mxu1  ;;  %v1487_v53 = vrot.slane %v1475_v41, 6  ;;  %v2482_v38 = vld [vmem:[%s2877_s17 + $0xac] ss:$16 sps:$4 sm:$0xff]  }
 0x69e   : > { %v1492_v46 = vadd.f32 %v1484_v39, %v1393_v42  ;;  %v1437_v48 = vpop.f32.mrb[23].mxu0  ;;  %v1478_v49 = vpop.f32.mrb[23].mxu1  ;;  %v1494_v54 = vadd.f32 %v1486_v35, %v1395_v36  ;;  %v2483_v39 = vld [vmem:[%s2877_s17 + $0xa0] ss:$16 sps:$4 sm:$0xff]   ;;  %v2484_v40 = vld [vmem:[%s2877_s17 + $0xa8] ss:$16 sps:$4 sm:$0xff]  }
 0x69f   : > { %v1493_v50 = vadd.f32 %v1485_v43, %v1394_v47  ;;  %v1495_v56 = vadd.f32 %v1487_v53, %v1396_v55  ;;  %v2485_v41 = vld [vmem:[%s2877_s17 + $0xc4] ss:$16 sps:$4 sm:$0xff]   ;;  %v2486_v42 = vld [vmem:[%s2877_s17 + $0xcc] ss:$16 sps:$4 sm:$0xff]   ;;  %v2487_v43 = vld [vmem:[%s2877_s17 + $0xc0] ss:$16 sps:$4 sm:$0xff]  }
 0x6a0   : > { %v2121_v51 = vmul.f32 -1.442695, %v1492_v46  ;;  %v2123_v57 = vmul.f32 -1.442695, %v1494_v54  ;;  %v2488_v44 = vld [vmem:[%s2877_s17 + $0xc8] ss:$16 sps:$4 sm:$0xff]  }
 0x6a1   : > { %v2122_v52 = vmul.f32 -1.442695, %v1493_v50  ;;  %v2489_v45 = vld [vmem:[%s2877_s17 + $0xe4] ss:$16 sps:$4 sm:$0xff]   ;;  %v2490_v46 = vld [vmem:[%s2877_s17 + $0xec] ss:$16 sps:$4 sm:$0xff]  }
 0x6a2   : > { %2415 = vpow2.f32 %v2121_v51  ;;  %v2491_v47 = vld [vmem:[%s2877_s17 + $0xe0] ss:$16 sps:$4 sm:$0xff]   ;;  %v2492_v48 = vld [vmem:[%s2877_s17 + $0xe8] ss:$16 sps:$4 sm:$0xff]   ;;  %v1523_v36 = vld [vmem:[#allocation3 + $0x20] sm:$0x30] }
 0x6a3   : > { %2417 = vpow2.f32 %v2122_v52 }
 0x6a4   : > { %2419 = vtanh.f32 %v1495_v56 }
 0x6a5   : > { %2421 = vpow2.f32 %v2123_v57  ;;  %v1524_v57 = vld [vmem:[#allocation3 + $0x28] sm:$0x30] }
 0x6ac   : > { %v2416_v58 = vpop.eup %2415 }
 0x6ad   : > { %v1505_v59 = vadd.f32 1.0, %v2416_v58  ;;  %v2418_v60 = vpop.eup %2417 }
 0x6ae   : > { %v1506_v61 = vadd.f32 1.0, %v2418_v60  ;;  %v2420_v62 = vpop.eup %2419 }
 0x6af   : > { %2423 = vrcp.f32 %v1505_v59  ;;  %v2422_v63 = vpop.eup %2421 }
 0x6b0   : > { %2425 = vrcp.f32 %v1506_v61  ;;  %v1507_v11 = vadd.f32 1.0, %v2422_v63 }
 0x6b2   : > { %2427 = vrcp.f32 %v1507_v11 }
 0x6b9   : > { %v2424_v0 = vpop.eup %2423 }
 0x6ba   : > { %v1519_v2 = vmul.f32 %v2424_v0, %v2420_v62  ;;  %v2426_v25 = vpop.eup %2425  ;;  %v1525_v0 = vld [vmem:[#allocation3 + $0x30] sm:$0x30] }
 0x6bb   : > { %v1518_v12 = vmul.f32 %v2426_v25, %v1516_v1  ;;  %v1526_v25 = vld [vmem:[#allocation3 + $0x38] sm:$0x30] }
 0x6bc   : > { %v2428_v15 = vpop.eup %2427 }
 0x6bd   : > { %v3266_v14 = vadd.f32 %v1519_v2, %v1518_v12 }
 0x6bf   : > { %2429 = vtanh.f32 %v3266_v14 }
 0x6c9   : > { %v2430_v29 = vpop.eup %2429 }
 0x6ca   : > { %v3269_v17 = vmul.f32 %v2430_v29, %v2428_v15 }
 0x6cc   : > { %v1527_v19 = vpack.c.bf16 %v3269_v17, %v3269_v17 }
 0x6ce   : > { %v1529_v16 = vrot.slane %v1527_v19, 1 }
 0x6d0   : > { %1564 = vmatmul.mubr.bf16.vlgmr.msra.gmra.mrb[24].mxu0 %v1529_v16  ;;  %1605 = vmatmul.mubr.bf16.vlgmr.msra.gmra.mrb[24].mxu1 %v1529_v16 }
 0x6d1   : > { %1665 = vmatpush1.bf16.msra.mxu0 %v2463_v22  ;;  %1706 = vmatpush1.bf16.msra.mxu1 %v2464_v23 }
 0x6d2   : > { %1666 = vmatprep.subr.bf16.mxu0 %v2465_v20  ;;  %1707 = vmatprep.subr.bf16.mxu1 %v2466_v24  ;;  %v1649_v24 = vrot.slane %v3266_v14, 6  ;;  %v1656_v14 = vld [vmem:[#allocation3 + $0x20] sm:$0xc0] }
 0x6d3   : > { %1696 = vmatprep.mubr.bf16.mxu0 %v2666_v3  ;;  %1737 = vmatprep.mubr.bf16.mxu1 %v2666_v3  ;;  %v2474_v3 = vld [vmem:[%s2877_s17 + $0x6c] ss:$16 sps:$4 sm:$0xff]  }
 0x6d5   : > { %1667 = vmatpush1.bf16.msra.mxu0 %v2467_v26  ;;  %1708 = vmatpush1.bf16.msra.mxu1 %v2468_v27 }
 0x6d6   : > { %1668 = vmatprep.subr.bf16.mxu0 %v2469_v30  ;;  %1709 = vmatprep.subr.bf16.mxu1 %v2470_v31 }
 0x6d9   : > { %1669 = vmatpush1.bf16.msra.mxu0 %v2471_v10  ;;  %1710 = vmatpush1.bf16.msra.mxu1 %v2472_v33 }
 0x6da   : > { %1670 = vmatprep.subr.bf16.mxu0 %v2473_v18  ;;  %1711 = vmatprep.subr.bf16.mxu1 %v2474_v3 }
 0x6dd   : > { %1671 = vmatpush1.bf16.msra.mxu0 %v2475_v5  ;;  %1712 = vmatpush1.bf16.msra.mxu1 %v2476_v34 }
 0x6de   : > { %1672 = vmatprep.subr.bf16.mxu0 %v2477_v4  ;;  %1713 = vmatprep.subr.bf16.mxu1 %v2478_v6 }
 0x6e1   : > { %1673 = vmatpush1.bf16.msra.mxu0 %v2479_v8  ;;  %1714 = vmatpush1.bf16.msra.mxu1 %v2480_v9 }
 0x6e2   : > { %1674 = vmatprep.subr.bf16.mxu0 %v2481_v37  ;;  %1715 = vmatprep.subr.bf16.mxu1 %v2482_v38 }
 0x6e5   : > { %1675 = vmatpush1.bf16.msra.mxu0 %v2483_v39  ;;  %1716 = vmatpush1.bf16.msra.mxu1 %v2484_v40 }
 0x6e6   : > { %1676 = vmatprep.subr.bf16.mxu0 %v2485_v41  ;;  %1717 = vmatprep.subr.bf16.mxu1 %v2486_v42  ;;  %v1657_v42 = vld [vmem:[#allocation3 + $0x28] sm:$0xc0] }
 0x6e9   : > { %1677 = vmatpush1.bf16.msra.mxu0 %v2487_v43  ;;  %1718 = vmatpush1.bf16.msra.mxu1 %v2488_v44 }
 0x6ea   : > { %1678 = vmatprep.subr.bf16.mxu0 %v2489_v45  ;;  %1719 = vmatprep.subr.bf16.mxu1 %v2490_v46 }
 0x6ed   : > { %1679 = vmatpush1.bf16.msra.mxu0 %v2491_v47  ;;  %1720 = vmatpush1.bf16.msra.mxu1 %v2492_v48 }
 0x7a3   : > { %v1565_v49 = vpop.f32.mrb[24].mxu0  ;;  %v1606_v50 = vpop.f32.mrb[24].mxu1 }
 0x7a4   : > { %v1617_v51 = vrot.slane %v1565_v49, 4  ;;  %v1567_v52 = vpop.f32.mrb[25].mxu0  ;;  %v1608_v35 = vpop.f32.mrb[25].mxu1  ;;  %v1619_v63 = vrot.slane %v1606_v50, 4  ;;  %v1658_v49 = vld [vmem:[#allocation3 + $0x30] sm:$0xc0] }
 0x7a5   : > { %v1618_v53 = vrot.slane %v1567_v52, 4  ;;  %v1569_v54 = vpop.f32.mrb[26].mxu0  ;;  %v1610_v55 = vpop.f32.mrb[26].mxu1  ;;  %v1620_v1 = vrot.slane %v1608_v35, 4  ;;  %v1659_v52 = vld [vmem:[#allocation3 + $0x38] sm:$0xc0] }
 0x7a6   : > { %v1625_v56 = vadd.f32 %v1617_v51, %v1523_v36  ;;  %v1570_v58 = vpop.f32.mrb[27].mxu0  ;;  %v1611_v59 = vpop.f32.mrb[27].mxu1  ;;  %v1627_v2 = vadd.f32 %v1619_v63, %v1525_v0 }
 0x7a7   : > { %v1626_v60 = vadd.f32 %v1618_v53, %v1524_v57  ;;  %v1628_v11 = vadd.f32 %v1620_v1, %v1526_v25 }
 0x7a8   : > { %v2124_v61 = vmul.f32 -1.442695, %v1625_v56  ;;  %v2126_v12 = vmul.f32 -1.442695, %v1627_v2 }
 0x7a9   : > { %v2125_v62 = vmul.f32 -1.442695, %v1626_v60 }
 0x7aa   : > { %2431 = vpow2.f32 %v2124_v61 }
 0x7ab   : > { %2433 = vpow2.f32 %v2125_v62 }
 0x7ac   : > { %2435 = vtanh.f32 %v1628_v11 }
 0x7ad   : > { %2437 = vpow2.f32 %v2126_v12  ;;  %v1794_v12 = vsel (!%p2130_p2), %vm1793_vm0, %v3059_v21, %v3101_v32 }
 0x7b4   : > { %v2432_v15 = vpop.eup %2431 }
 0x7b5   : > { %v1638_v29 = vadd.f32 1.0, %v2432_v15  ;;  %v2434_v19 = vpop.eup %2433  ;;  %v1799_v15 = vsel (!%p2130_p2), %vm1793_vm0, %v3227_v7, %v3269_v17 }
 0x7b6   : > { %v1639_v16 = vadd.f32 1.0, %v2434_v19  ;;  %v2436_v22 = vpop.eup %2435 }
 0x7b7   : > { %2439 = vrcp.f32 %v1638_v29  ;;  %v2438_v23 = vpop.eup %2437  ;;  %v1796_v29 = vsel (!%p2130_p2), %vm1795_vm1, %v1794_v12, %v3143_v13 }
 0x7b8   : > { %2441 = vrcp.f32 %v1639_v16  ;;  %v1640_v30 = vadd.f32 1.0, %v2438_v23  ;;  %v1798_v16 = vsel (!%p2130_p2), %vm1797_vm2, %v1796_v29, %v3185_v28 }
 0x7ba   : > { %2443 = vrcp.f32 %v1640_v30 }
 0x7c1   : > { %v2440_v20 = vpop.eup %2439 }
 0x7c2   : > { %v1652_v26 = vmul.f32 %v2440_v20, %v2436_v22  ;;  %v2442_v27 = vpop.eup %2441 }
 0x7c3   : > { %v1651_v31 = vmul.f32 %v2442_v27, %v1649_v24 }
 0x7c4   : > { %v2444_v33 = vpop.eup %2443 }
 0x7c5   : > { %v1653_v10 = vadd.f32 %v1652_v26, %v1651_v31 }
 0x7c7   : > { %2445 = vtanh.f32 %v1653_v10  ;;  %v1782_v60 = vrot.slane %v1653_v10, 6 }
 0x7d1   : > { %v2446_v18 = vpop.eup %2445 }
 0x7d2   : > { %v1655_v3 = vmul.f32 %v2446_v18, %v2444_v33 }
 0x7d4   : > { %v1660_v5 = vpack.c.bf16 %v1655_v3, %v1655_v3  ;;  %v1800_v19 = vsel (!%p2130_p2), %vm1795_vm1, %v1799_v15, %v1655_v3 }
 0x7d6   : > { %v1662_v34 = vrot.slane %v1660_v5, 2 }
 0x7d8   : > { %1697 = vmatmul.mubr.bf16.vlgmr.msra.gmra.mrb[28].mxu0 %v1662_v34  ;;  %1738 = vmatmul.mubr.bf16.vlgmr.msra.gmra.mrb[28].mxu1 %v1662_v34 }
 0x8ab   : > { %v1698_v4 = vpop.f32.mrb[28].mxu0  ;;  %v1739_v6 = vpop.f32.mrb[28].mxu1 }
 0x8ac   : > { %v1750_v8 = vrot.slane %v1698_v4, 2  ;;  %v1700_v9 = vpop.f32.mrb[29].mxu0  ;;  %v1741_v37 = vpop.f32.mrb[29].mxu1  ;;  %v1752_v48 = vrot.slane %v1739_v6, 2 }
 0x8ad   : > { %v1751_v38 = vrot.slane %v1700_v9, 2  ;;  %v1702_v39 = vpop.f32.mrb[30].mxu0  ;;  %v1743_v40 = vpop.f32.mrb[30].mxu1  ;;  %v1753_v50 = vrot.slane %v1741_v37, 2 }
 0x8ae   : > { %v1758_v41 = vadd.f32 %v1750_v8, %v1656_v14  ;;  %v1703_v43 = vpop.f32.mrb[31].mxu0  ;;  %v1744_v44 = vpop.f32.mrb[31].mxu1  ;;  %v1760_v51 = vadd.f32 %v1752_v48, %v1658_v49 }
 0x8af   : > { %v1759_v45 = vadd.f32 %v1751_v38, %v1657_v42  ;;  %v1761_v35 = vadd.f32 %v1753_v50, %v1659_v52 }
 0x8b0   : > { %v2127_v46 = vmul.f32 -1.442695, %v1758_v41  ;;  %v2129_v36 = vmul.f32 -1.442695, %v1760_v51 }
 0x8b1   : > { %v2128_v47 = vmul.f32 -1.442695, %v1759_v45 }
 0x8b2   : > { %2447 = vpow2.f32 %v2127_v46 }
 0x8b3   : > { %2449 = vpow2.f32 %v2128_v47 }
 0x8b4   : > { %2451 = vtanh.f32 %v1761_v35 }
 0x8b5   : > { %2453 = vpow2.f32 %v2129_v36 }
 0x8bc   : > { %v2448_v53 = vpop.eup %2447 }
 0x8bd   : > { %v1771_v54 = vadd.f32 1.0, %v2448_v53  ;;  %v2450_v55 = vpop.eup %2449 }
 0x8be   : > { %v1772_v56 = vadd.f32 1.0, %v2450_v55  ;;  %v2452_v57 = vpop.eup %2451 }
 0x8bf   : > { %2455 = vrcp.f32 %v1771_v54  ;;  %v2454_v58 = vpop.eup %2453 }
 0x8c0   : > { %2457 = vrcp.f32 %v1772_v56  ;;  %v1773_v63 = vadd.f32 1.0, %v2454_v58 }
 0x8c2   : > { %2459 = vrcp.f32 %v1773_v63 }
 0x8c9   : > { %v2456_v59 = vpop.eup %2455 }
 0x8ca   : > { %v1785_v61 = vmul.f32 %v2456_v59, %v2452_v57  ;;  %v2458_v62 = vpop.eup %2457 }
 0x8cb   : > { %v1784_v0 = vmul.f32 %v2458_v62, %v1782_v60 }
 0x8cc   : > { %v2460_v2 = vpop.eup %2459 }
 0x8cd   : > { %v1786_v1 = vadd.f32 %v1785_v61, %v1784_v0 }
 0x8cf   : > { %2461 = vtanh.f32 %v1786_v1 }
 0x8d4   : > { %1792 = sbr.rel (%p2130_p2) target bundleno = 2272 (0x8e0), region = 64 }
 0x8d9   : > { %v2462_v25 = vpop.eup %2461 }
 0x8da   : > { %v1788_v11 = vmul.f32 %v2462_v25, %v2460_v2 }
 0x8dc   : > { %v1801_v22 = vsel %vm1797_vm2, %v1800_v19, %v1788_v11 }
 0x8dd   : > { %v1802_v23 = vpack.c.bf16 %v1801_v22, %v1798_v16 }
 0x8df   : > { %1803 = vst [vmem:[#allocation2] sm:$0xff] %v1802_v23 }
 0x8e0 PF: > { %p2131_p7 = scmp.ne.s32.totalorder %s2724_s25, 2 }
 0x8e1   : > { %v2493_v20 = vld [vmem:[%s3381_s4] sm:$0xff] (!%p2131_p7)   ;;  %v2667_v21 = vmov (!%p2131_p7), 0.0   ;;  %v2494_v32 = vld [vmem:[%s3381_s4 + $0x8] sm:$0xff] (!%p2131_p7)   ;;  %vm2668_vm3 = vmmov (!%p2131_p7), 0   ;;  %v2495_v13 = vld [vmem:[%s3381_s4 + $0x10] sm:$0xff] (!%p2131_p7)   ;;  %v1808_v26 = vpack.c.bf16 (!%p2131_p7), %v1788_v11, %v1788_v11 }
 0x8e2   : > { %1807 = sbr.rel (%p2131_p7) target bundleno = 2521 (0x9d9), region = 68  ;;  %2157 = vmatprep.subr.bf16.mxu0 (!%p2131_p7), %v2667_v21  ;;  %2173 = vmatprep.mubr.msk.bf16.mxu0 (!%p2131_p7), %vm2668_vm3, %v2667_v21  ;;  %v2496_v28 = vld [vmem:[%s3381_s4 + $0x18] sm:$0xff] (!%p2131_p7)   ;;  %v2497_v7 = vld [vmem:[%s3381_s4 + $0x20] sm:$0xff] (!%p2131_p7)   ;;  %v2498_v17 = vld [vmem:[%s3381_s4 + $0x28] sm:$0xff] (!%p2131_p7)  }
 0x8e3   : > { %2158 = vmatpush3.bf16.msra.mxu0 (!%p2131_p7), %v2493_v20  ;;  %v2499_v24 = vld [vmem:[%s3381_s4 + $0x30] sm:$0xff] (!%p2131_p7)   ;;  %v2500_v27 = vld [vmem:[%s3381_s4 + $0x38] sm:$0xff] (!%p2131_p7)   ;;  %v1833_v30 = vrot.slane (!%p2131_p7), %v1808_v26, 3  ;;  %v2132_v31 = vld [vmem:[%s3382_s5] ss:$0 sm:$0xff] (!%p2131_p7) }
 0x8e4   : > { %2159 = vmatprep.subr.bf16.mxu0 (!%p2131_p7), %v2667_v21 }
 0x8e7   : > { %2160 = vmatpush3.bf16.msra.mxu0 (!%p2131_p7), %v2494_v32 }
 0x8e8   : > { %2161 = vmatprep.subr.bf16.mxu0 (!%p2131_p7), %v2667_v21 }
 0x8eb   : > { %2162 = vmatpush3.bf16.msra.mxu0 %v2495_v13 }
 0x8ec   : > { %2163 = vmatprep.subr.bf16.mxu0 %v2667_v21 }
 0x8ef   : > { %2164 = vmatpush3.bf16.msra.mxu0 %v2496_v28 }
 0x8f0   : > { %2165 = vmatprep.subr.bf16.mxu0 %v2667_v21 }
 0x8f3   : > { %2166 = vmatpush3.bf16.msra.mxu0 %v2497_v7 }
 0x8f4   : > { %2167 = vmatprep.subr.bf16.mxu0 %v2667_v21 }
 0x8f7   : > { %2168 = vmatpush3.bf16.msra.mxu0 %v2498_v17 }
 0x8f8   : > { %2169 = vmatprep.subr.bf16.mxu0 %v2667_v21 }
 0x8fb   : > { %2170 = vmatpush3.bf16.msra.mxu0 %v2499_v24 }
 0x8fc   : > { %2171 = vmatprep.subr.bf16.mxu0 %v2667_v21 }
 0x8ff   : > { %2172 = vmatpush3.bf16.msra.mxu0 %v2500_v27 }
 0x902   : > { %2174 = vmatmul.mubr.bf16.vlgmr.msra.gmra.mrb[0].mxu0 %v1833_v30 }
 0x9d5   : > { %v1917_v10 = vpop.f32.mrb[0].mxu0 }
 0x9d6   : > { %v1918_v33 = vadd.f32 %v2132_v31, %v1917_v10  ;;  %v2175_v18 = vpop.f32.mrb[1].mxu0 }
 0x9d7   : > { %v1920_v3 = vpop.f32.mrb[2].mxu0 }
 0x9d8   : > { %1923 = vst [vmem:[#allocation10] sm:$0x3] %v1918_v33  ;;  %v2176_v5 = vpop.f32.mrb[3].mxu0 }
 0x9d9 PF: > { %p2198_p9 = scmp.eq.s32.totalorder %s2724_s25, 2  ;;  %s2669_s19 = smov [#allocation10]  }
 0x9da   : > { %s1931_s17 = sshll.u32 %s2669_s19, 4  ;;  %s1932_s17 = int_to_ptr.vmem [resolvable:$true] %s1931_s17 }
 0x9db   : > { %s2591_s27 = scalar_lea.vmem %s1932_s17, 32  ;;  %p2598_p6 = scmp.lt.s32.totalorder %s1932_s17, %s1932_s17 }
 0x9dc   : > { %p2592_p0 = scmp.ne.s32.totalorder %s1932_s17, %s2591_s27  ;;  %p2599_p10 = scmp.lt.s32.totalorder %s2591_s27, %s2591_s27 }
 0x9de   : > { %p2593_p3 = pnand %p2592_p0, %p2198_p9  ;;  %p2600_p4 = por %p2599_p10, %p2598_p6 }
 0x9e0   : > { %p2594_p5 = pneg %p2593_p3 }
 0x9e2   : > { %p2601_p1 = pnand %p2600_p4, %p2594_p5 }
 0x9e4   : > { %2604 = shalt.err (!%p2601_p1)
}
 0x9e5   : > { %s2605_s20 = scalar_lea.hbm %s3383_s6, 32 }
 0x9e6   : > { %p2606_p13 = scmp.ne.s32.totalorder %s3383_s6, %s2605_s20  ;;  %p2611_p8 = scmp.lt.u32.totalorder %s2605_s20, %s3383_s6 }
 0x9e8   : > { %p2607_p11 = pnand %p2606_p13, %p2198_p9 }
 0x9ea   : > { %p2608_p12 = pneg %p2607_p11 }
 0x9ec   : > { %p2613_p2 = pnand %p2611_p8, %p2608_p12 }
 0x9ee   : > { %2616 = shalt.err (!%p2613_p2)
}
 0x9ef   : > { %2184 = dma.vmem_to_hbm [thread:$0]  (%p2198_p9), %s1932_s17, 32, %s3383_s6, [#allocation6]  }
 0x9f0   : > { %2642 = dma.done.wait (%p2198_p9), [#allocation6], 32  }
 0x9f1   : > { %2644 = vsyncadd (%p2198_p9), [#allocation6], 4294967264 }
 0x9f2 PF: > { %s3409_s24 = sld [smem:[#allocation15_spill]]  ;;  %s3410_s13 = sld [smem:[#allocation14_spill]] }
 0x9f3   : > { %s3411_s23 = sld [smem:[#allocation16_spill]]  ;;  %s3412_s21 = smov %s2651_s22 }
 0x9f8   : > { %p20_p7 = scmp.ge.s32.totalorder %s3409_s24, 5   ;;  %s3413_s22 = smov %s3410_s13 }
 0x9fa   :  { %22 = sbr.rel (!%p20_p7) target bundleno = 9 (0x9), region = 117 }
 0xa01   :  { %1944 = vsyncpa [#allocation5], 1 }
 0xa02   :  { %1946 = vsyncpa [#allocation5 + $0x1], 1 }
 0xa03   :  { %1947 = vsyncpa [#allocation8], 1 }
 0xa04   :  { %1949 = vsyncpa [#allocation8 + $0x1], 1 }
 0xa05   :  { %1950 = vsyncpa [#allocation6], 1 }
 0xa06   :  { %1952 = vsyncpa [#allocation6 + $0x1], 1 }

</bundles_post_ra>
